<compile_context>
chip_gen: v7x
topology: tpu7x:2x2x1
jax: 0.10.0
libtpu: 0.0.40
codegen_flags: <defaults>
</compile_context>

<pallas_src>
import functools

import numpy as np

import jax
import jax.numpy as jnp
from jax.experimental import pallas as pl
from jax.experimental.pallas import tpu as pltpu

EMBED_DIM = 128
OUT_CHANNELS = 96
BLOCK_NUM = 3
KERNEL_SIZE = 3
C_PAD = 128  # lane-dense channel width used for all intermediates


# ---------------------------------------------------------------------------
# Fused Pallas kernel: all conv layers + avg-pool + linear for one batch tile
# ---------------------------------------------------------------------------
def _mcnn_fused_kernel(vlen_ref, x_ref, wc_ref, bc_ref, wl_ref, bl_ref, o_ref,
                       *, L_pad, block_num):
    """vlen_ref: (1,) int32 SMEM     true max sequence length (valid_len)
    x_ref:  (Bt, L_pad, 128)         padded embeddings (NLC), compute dtype
    wc_ref: (n_layers, 128, 384)     fused conv weights (taps concat on Cout)
    bc_ref: (n_layers, 1, 128)       conv biases, f32 (zero-padded 96->128)
    wl_ref: (block_num, 128, 128)    per-block slices of final Linear, f32
    bl_ref: (1, 128)                 Linear bias, f32
    o_ref:  (Bt, 128)                graph features, f32 (sliced outside)
    """
    Bt = x_ref.shape[0]
    C = x_ref.shape[2]
    BtL = Bt * L_pad

    vlen = vlen_ref[0]
    inv_len = 1.0 / vlen.astype(jnp.float32)

    # Flatten batch*length into the MXU M dimension (layout-preserving:
    # L_pad is a multiple of 8).
    x = x_ref[...].reshape(BtL, C)

    # Narrow (BtL, 1) position masks, lane-broadcast by jnp.where; reused by
    # all conv layers.
    pos = jax.lax.broadcasted_iota(jnp.int32, (BtL, 1), 0) % L_pad
    first_row = pos == 0            # roll wrap at sequence start
    last_row = pos == vlen - 1      # conv zero-padding at true sequence end
    in_seq = pos < vlen             # excludes sublane-alignment rows

    acc = jnp.zeros((Bt, C), jnp.float32)
    layer = 0
    for bi in range(block_num):
        h = x
        h_f32 = None
        for _ in range(bi + 1):
            # One lane-dense MXU matmul for all 3 taps: (BtL,128)x(128,384),
            # bf16 inputs, f32 accumulation.
            y = jnp.dot(h, wc_ref[layer], preferred_element_type=jnp.float32)
            # tap k=0 contributes to row l from row l-1 -> roll down by 1
            y0 = jnp.where(first_row, 0.0, pltpu.roll(y[:, 0:C], 1, 0))
            # tap k=1 contributes in place
            y1 = y[:, C:2 * C]
            # tap k=2 contributes to row l from row l+1 -> roll up by 1
            y2 = jnp.where(last_row, 0.0,
                           pltpu.roll(y[:, 2 * C:3 * C], BtL - 1, 0))
            h_f32 = jnp.maximum(y0 + y1 + y2 + bc_ref[layer], 0.0)
            h = h_f32.astype(x.dtype)   # next matmul input in compute dtype
            layer += 1

        # AdaptiveAvgPool1d(1): masked sublane sum over valid rows, * 1/vlen.
        pooled = jnp.sum(jnp.where(in_seq, h_f32, 0.0).reshape(Bt, L_pad, C),
                         axis=1) * inv_len
        # Final Linear folded in block-wise: concat+Linear == sum of matmuls.
        acc = acc + jnp.dot(pooled, wl_ref[bi],
                            preferred_element_type=jnp.float32)

    o_ref[...] = acc + bl_ref[...]


def _pick_batch_tile(B, L_pad, target_rows=1024):
    """Largest batch tile with Bt*L_pad ~ target_rows such that Bt divides B
    and the (Bt, 128) output block is legal (Bt == B or Bt % 8 == 0).
    Keeps >= 2 grid steps when B >= 16 so both v7x TensorCores get work."""
    valid = [d for d in range(1, B + 1)
             if B % d == 0 and (d == B or d % 8 == 0)]
    if B >= 16:
        capped = [d for d in valid if d <= B // 2]
        if capped:
            valid = capped
    want = max(1, min(B, (target_rows + L_pad - 1) // L_pad))
    le = [d for d in valid if d <= want]
    return max(le) if le else min(valid)
    # TODO(synk): for very long sequences (L_pad >~ 2-4K) add a length-chunk
    # grid axis (with halo handling for the conv taps) so per-step
    # intermediates stay within v7x's 64 MiB VMEM.


def mcnn_fused(valid_len, x_pad, wc, bc, wl, bl, *, L_pad, block_num,
               batch_tile):
    B = x_pad.shape[0]
    n_layers = wc.shape[0]
    Bt = batch_tile

    kernel = functools.partial(_mcnn_fused_kernel, L_pad=L_pad,
                               block_num=block_num)

    return pl.pallas_call(
        kernel,
        out_shape=jax.ShapeDtypeStruct((B, C_PAD), jnp.float32),
        grid_spec=pltpu.PrefetchScalarGridSpec(
            num_scalar_prefetch=1,          # valid_len -> SMEM
            grid=(B // Bt,),
            in_specs=[
                pl.BlockSpec((Bt, L_pad, C_PAD), lambda i, vlen: (i, 0, 0)),
                pl.BlockSpec((n_layers, C_PAD, KERNEL_SIZE * C_PAD),
                             lambda i, vlen: (0, 0, 0)),
                pl.BlockSpec((n_layers, 1, C_PAD), lambda i, vlen: (0, 0, 0)),
                pl.BlockSpec((block_num, C_PAD, C_PAD),
                             lambda i, vlen: (0, 0, 0)),
                pl.BlockSpec((1, C_PAD), lambda i, vlen: (0, 0)),
            ],
            out_specs=pl.BlockSpec((Bt, C_PAD), lambda i, vlen: (i, 0)),
        ),
        compiler_params=pltpu.CompilerParams(
            dimension_semantics=("parallel",),        # megacore on v7x
            vmem_limit_bytes=32 * 1024 * 1024),       # safe on v5e/v6e/v7x
    )(valid_len, x_pad, wc, bc, wl, bl)


# ---------------------------------------------------------------------------
# Parameter construction (deterministic, matches nn.Module shapes)
# ---------------------------------------------------------------------------
def init_params(key, input_dim, embedding_dim=EMBED_DIM, block_num=BLOCK_NUM):
    keys = jax.random.split(key, 2 + block_num * 8)
    ki = iter(keys)

    # nn.Embedding(input_dim, embedding_dim, padding_idx=0)
    embed = jax.random.normal(next(ki), (input_dim, embedding_dim),
                              jnp.float32) * 0.1
    embed = embed.at[0].set(0.0)  # padding_idx=0 row is zero

    blocks = []
    for block_idx in range(block_num):
        layers = []
        for layer_idx in range(block_idx + 1):
            cin = embedding_dim if layer_idx == 0 else OUT_CHANNELS
            scale = 1.0 / jnp.sqrt(cin * KERNEL_SIZE)
            # stored as (K, Cin, Cout); PyTorch Conv1d weight is (Cout, Cin, K)
            w = jax.random.uniform(
                next(ki), (KERNEL_SIZE, cin, OUT_CHANNELS), jnp.float32,
                minval=-scale, maxval=scale)
            b = jax.random.uniform(
                next(ki), (1, OUT_CHANNELS), jnp.float32,
                minval=-scale, maxval=scale)
            layers.append((w, b))
        blocks.append(layers)

    # nn.Linear(block_num * 96, 96); stored as (Din, Dout)
    din = block_num * OUT_CHANNELS
    scale = 1.0 / jnp.sqrt(din)
    lin_w = jax.random.uniform(next(ki), (din, OUT_CHANNELS), jnp.float32,
                               minval=-scale, maxval=scale)
    lin_b = jax.random.uniform(next(ki), (1, OUT_CHANNELS), jnp.float32,
                               minval=-scale, maxval=scale)

    return {"embed": embed, "blocks": blocks, "lin_w": lin_w, "lin_b": lin_b,
            "padding_id": float(input_dim - 1)}


def pack_params(params, compute_dtype=jnp.bfloat16):
    """Pack raw (PyTorch-shaped) params into lane-dense fused kernel operands."""
    blocks = params["blocks"]
    block_num = len(blocks)

    wc_list, bc_list = [], []
    for block in blocks:
        for (w, b) in block:                       # w: (3, Cin, 96), b: (1, 96)
            K, cin, cout = w.shape
            wf = jnp.zeros((C_PAD, K * C_PAD), jnp.float32)
            for k in range(K):
                wf = wf.at[:cin, k * C_PAD:k * C_PAD + cout].set(w[k])
            bf = jnp.zeros((1, C_PAD), jnp.float32).at[:, :cout].set(b)
            wc_list.append(wf)
            bc_list.append(bf)
    wc = jnp.stack(wc_list).astype(compute_dtype)  # (n_layers, 128, 384)
    bc = jnp.stack(bc_list)                        # (n_layers, 1, 128) f32

    lin_w = params["lin_w"]                        # (block_num*96, 96)
    wl = jnp.zeros((block_num, C_PAD, C_PAD), jnp.float32)
    for bi in range(block_num):
        wl = wl.at[bi, :OUT_CHANNELS, :OUT_CHANNELS].set(
            lin_w[bi * OUT_CHANNELS:(bi + 1) * OUT_CHANNELS])
    bl = jnp.zeros((1, C_PAD), jnp.float32).at[:, :OUT_CHANNELS].set(
        params["lin_b"])
    return wc, bc, wl, bl


# ---------------------------------------------------------------------------
# Padding glue: single masked gather, with length bucketing (fewer recompiles)
# ---------------------------------------------------------------------------
def _bucket_length(max_len, pad_multiple=8):
    """Round up to a multiple of pad_multiple, then to the next value of the
    form {2^k, 1.5*2^k} (<= 33% padding waste, few distinct compiles)."""
    n = -(-max_len // pad_multiple) * pad_multiple
    p = pad_multiple
    while p < n:
        p <<= 1
    q = (3 * p) // 4
    if q >= n and q % pad_multiple == 0:
        return q
    return p


def variadic_to_padded(features, lengths, fill_value, pad_multiple=8,
                       bucket=True):
    """(sum(lengths), D) -> (B, L_pad, D).
    Rows [len_i, max_len) are filled with `fill_value` (torchdrug semantics);
    rows [max_len, L_pad) exist only for alignment/bucketing, are zero, and
    are masked inside the kernel (dynamic valid_len)."""
    lengths = np.asarray(lengths, np.int32)
    max_len = int(lengths.max())
    if bucket:
        L_pad = _bucket_length(max_len, pad_multiple)
    else:
        L_pad = -(-max_len // pad_multiple) * pad_multiple
    offsets = np.concatenate([[0], np.cumsum(lengths)[:-1]]).astype(np.int32)
    pos = np.arange(L_pad, dtype=np.int32)[None, :]                  # (1, L_pad)
    idx = offsets[:, None] + np.minimum(pos, lengths[:, None] - 1)   # (B, L_pad)
    in_seq = pos < lengths[:, None]
    fill_zone = (pos < max_len) & (~in_seq)

    gathered = features[jnp.asarray(idx)]                            # (B, L_pad, D)
    in_seq_j = jnp.asarray(in_seq)[:, :, None]
    fill_j = jnp.asarray(fill_zone)[:, :, None]
    padded = jnp.where(in_seq_j, gathered,
                       jnp.where(fill_j, jnp.float32(fill_value),
                                 jnp.float32(0.0)))
    return padded, max_len, L_pad


# ---------------------------------------------------------------------------
# Forward pass
# ---------------------------------------------------------------------------
def mcnn_forward(tokens, lengths, params, *, target_rows=1024,
                 compute_dtype=jnp.bfloat16):
    """tokens: int32 (sum(lengths),) residue token ids (= one_hot.nonzero()[:,1]).
    Returns {'graph_feature': (n_graphs, 96)}."""
    # glue: embedding lookup (plain JAX gather) + single-gather padding
    emb = params["embed"][tokens].astype(jnp.float32)                # (N, 128)
    x, max_len, L_pad = variadic_to_padded(emb, lengths, params["padding_id"])
    if x.shape[-1] < C_PAD:   # lane-dense input channels
        x = jnp.pad(x, ((0, 0), (0, 0), (0, C_PAD - x.shape[-1])))
    x = x.astype(compute_dtype)

    B = x.shape[0]
    block_num = len(params["blocks"])
    Bt = _pick_batch_tile(B, L_pad, target_rows)

    wc, bc, wl, bl = pack_params(params, compute_dtype)
    valid_len = jnp.array([max_len], dtype=jnp.int32)   # dynamic, no recompile

    out = mcnn_fused(valid_len, x, wc, bc, wl, bl,
                     L_pad=L_pad, block_num=block_num, batch_tile=Bt)
    return {"graph_feature": out[:, :OUT_CHANNELS]}


# ---------------------------------------------------------------------------
# Pure-JAX reference (XLA conv) for correctness checking
# ---------------------------------------------------------------------------
def mcnn_reference(tokens, lengths, params):
    emb = params["embed"][tokens].astype(jnp.float32)
    x, _, _ = variadic_to_padded(emb, lengths, params["padding_id"],
                                 pad_multiple=1, bucket=False)  # exact max_len
    x_ncw = jnp.transpose(x, (0, 2, 1))                # NCW like PyTorch
    pooled = []
    for block in params["blocks"]:
        h = x_ncw
        for (w, b) in block:
            w_oik = jnp.transpose(w, (2, 1, 0))        # (Cout, Cin, K)
            h = jax.lax.conv_general_dilated(
                h, w_oik, window_strides=(1,), padding=[(1, 1)],
                dimension_numbers=("NCH", "OIH", "NCH"))
            h = jnp.maximum(h + b.reshape(1, -1, 1), 0.0)
        pooled.append(jnp.mean(h, axis=-1))
    feat = jnp.concatenate(pooled, axis=-1)
    return feat @ params["lin_w"] + params["lin_b"]


if __name__ == "__main__":
    key = jax.random.PRNGKey(0)
    k_params, k_tok = jax.random.split(key)

    input_dim = 26                       # vocab size (residue types)
    lengths = [8, 6]                     # num_residues per graph (2 graphs)
    n_total = sum(lengths)

    params = init_params(k_params, input_dim)
    tokens = jax.random.randint(k_tok, (n_total,), 0, input_dim,
                                dtype=jnp.int32)

    ref = jax.block_until_ready(mcnn_reference(tokens, lengths, params))

    # f32 validation path (algorithm check vs XLA reference, tight tolerance)
    out_f32 = mcnn_forward(tokens, lengths, params, compute_dtype=jnp.float32)
    gf_f32 = jax.block_until_ready(out_f32["graph_feature"])
    assert gf_f32.shape == (len(lengths), OUT_CHANNELS)
    assert jnp.allclose(gf_f32, ref, atol=1e-4, rtol=1e-4), (
        "Pallas f32 output mismatch vs reference")

    # bf16 MXU production path (loose tolerance vs f32 reference)
    out_bf16 = mcnn_forward(tokens, lengths, params)   # bf16 default
    gf_bf16 = jax.block_until_ready(out_bf16["graph_feature"])
    assert gf_bf16.shape == (len(lengths), OUT_CHANNELS)
    rel_err = jnp.linalg.norm(gf_bf16 - ref) / (jnp.linalg.norm(ref) + 1e-12)
    assert rel_err < 2e-2, f"Pallas bf16 output rel error too high: {rel_err}"

    print("KERNEL_OK")
</pallas_src>

<mosaic_0001>
module attributes {stable_mosaic.version = 11 : i64} {
  func.func @_mcnn_fused_kernel(%arg0: i32, %arg1: memref<1xi32, #tpu.memory_space<smem>>, %arg2: memref<2x8x128xf32, #tpu.memory_space<vmem>>, %arg3: memref<6x128x384xf32, #tpu.memory_space<vmem>>, %arg4: memref<6x1x128xf32, #tpu.memory_space<vmem>>, %arg5: memref<3x128x128xf32, #tpu.memory_space<vmem>>, %arg6: memref<1x128xf32, #tpu.memory_space<vmem>>, %arg7: memref<2x128xf32, #tpu.memory_space<vmem>>) attributes {dimension_semantics = [#tpu.dimension_semantics<parallel>], iteration_bounds = array<i64: 1>, scalar_prefetch = 1 : i64, scratch_operands = 0 : i64, tpu.core_type = #tpu.core_type<tc>, window_params = [{transform_indices = @transform_0, window_bounds = array<i64: 2, 8, 128>}, {pipeline_mode = #tpu.pipeline_mode<synchronous>, transform_indices = @transform_1, window_bounds = array<i64: 6, 128, 384>}, {pipeline_mode = #tpu.pipeline_mode<synchronous>, transform_indices = @transform_2, window_bounds = array<i64: 6, 1, 128>}, {pipeline_mode = #tpu.pipeline_mode<synchronous>, transform_indices = @transform_3, window_bounds = array<i64: 3, 128, 128>}, {pipeline_mode = #tpu.pipeline_mode<synchronous>, transform_indices = @transform_4, window_bounds = array<i64: 1, 128>}, {transform_indices = @transform_5, window_bounds = array<i64: 2, 128>}]} {
    %c0 = arith.constant 0 : index
    %0 = memref.load %arg1[%c0] : memref<1xi32, #tpu.memory_space<smem>>
    %1 = arith.sitofp %0 : i32 to f32
    %cst = arith.constant 1.000000e+00 : f32
    %2 = arith.divf %cst, %1 : f32
    %c0_0 = arith.constant 0 : index
    %c0_1 = arith.constant 0 : index
    %c0_2 = arith.constant 0 : index
    %3 = vector.load %arg2[%c0_0, %c0_1, %c0_2] : memref<2x8x128xf32, #tpu.memory_space<vmem>>, vector<2x8x128xf32>
    %4 = vector.shape_cast %3 : vector<2x8x128xf32> to vector<16x128xf32>
    %5 = tpu.iota {dimensions = array<i32: 0>} : vector<16x1xi32>
    %c8_i32 = arith.constant 8 : i32
    %c0_i32 = arith.constant 0 : i32
    %6 = arith.cmpi eq, %c8_i32, %c0_i32 : i32
    %c1_i32 = arith.constant 1 : i32
    %7 = arith.select %6, %c1_i32, %c8_i32 : i32
    %8 = vector.broadcast %7 : i32 to vector<16x1xi32>
    %9 = arith.remsi %5, %8 : vector<16x1xi32>
    %c0_i32_3 = arith.constant 0 : i32
    %10 = vector.broadcast %c0_i32_3 : i32 to vector<16x1xi32>
    %11 = arith.cmpi ne, %9, %10 : vector<16x1xi32>
    %c0_i32_4 = arith.constant 0 : i32
    %12 = vector.broadcast %c0_i32_4 : i32 to vector<16x1xi32>
    %13 = arith.cmpi slt, %9, %12 : vector<16x1xi32>
    %c0_i32_5 = arith.constant 0 : i32
    %14 = arith.cmpi slt, %7, %c0_i32_5 : i32
    %15 = vector.broadcast %14 : i1 to vector<16x1xi1>
    %16 = vector.broadcast %15 : vector<16x1xi1> to vector<16x1xi1>
    %17 = arith.xori %13, %16 : vector<16x1xi1>
    %18 = arith.andi %17, %11 : vector<16x1xi1>
    %19 = vector.broadcast %7 : i32 to vector<16x1xi32>
    %20 = arith.addi %9, %19 : vector<16x1xi32>
    %21 = arith.select %18, %20, %9 : vector<16x1xi1>, vector<16x1xi32>
    %c0_i32_6 = arith.constant 0 : i32
    %22 = vector.broadcast %c0_i32_6 : i32 to vector<16x1xi32>
    %23 = arith.cmpi eq, %21, %22 : vector<16x1xi32>
    %c1_i32_7 = arith.constant 1 : i32
    %24 = arith.subi %0, %c1_i32_7 : i32
    %25 = vector.broadcast %24 : i32 to vector<16x1xi32>
    %26 = arith.cmpi eq, %21, %25 : vector<16x1xi32>
    %27 = vector.broadcast %0 : i32 to vector<16x1xi32>
    %28 = arith.cmpi slt, %21, %27 : vector<16x1xi32>
    %cst_8 = arith.constant 0.000000e+00 : f32
    %29 = vector.broadcast %cst_8 : f32 to vector<2x128xf32>
    %c0_9 = arith.constant 0 : index
    %c0_10 = arith.constant 0 : index
    %c0_11 = arith.constant 0 : index
    %30 = vector.load %arg3[%c0_9, %c0_10, %c0_11] : memref<6x128x384xf32, #tpu.memory_space<vmem>>, vector<1x128x384xf32>
    %31 = vector.shape_cast %30 : vector<1x128x384xf32> to vector<128x384xf32>
    %cst_12 = arith.constant dense<0.000000e+00> : vector<16x384xf32>
    %32 = tpu.matmul %4, %31, %cst_12 {dimension_numbers = #tpu.dot_dimension_numbers<[1], [0], [0], [1], [0, 0, 1, 1], [], []>} : vector<16x128xf32>, vector<128x384xf32>, vector<16x384xf32> -> vector<16x384xf32>
    %33 = vector.extract_strided_slice %32 {offsets = [0, 0], sizes = [16, 128], strides = [1, 1]} : vector<16x384xf32> to vector<16x128xf32>
    %c1_i32_13 = arith.constant 1 : i32
    %34 = tpu.dynamic_rotate %33 by %c1_i32_13 dim 0 : vector<16x128xf32>, i32 -> vector<16x128xf32>
    %cst_14 = arith.constant 0.000000e+00 : f32
    %35 = vector.shape_cast %23 : vector<16x1xi1> to vector<16x1xi1>
    %36 = vector.broadcast %35 : vector<16x1xi1> to vector<16x128xi1>
    %37 = vector.broadcast %cst_14 : f32 to vector<16x128xf32>
    %38 = arith.select %36, %37, %34 : vector<16x128xi1>, vector<16x128xf32>
    %39 = vector.extract_strided_slice %32 {offsets = [0, 128], sizes = [16, 128], strides = [1, 1]} : vector<16x384xf32> to vector<16x128xf32>
    %40 = vector.extract_strided_slice %32 {offsets = [0, 256], sizes = [16, 128], strides = [1, 1]} : vector<16x384xf32> to vector<16x128xf32>
    %c15_i32 = arith.constant 15 : i32
    %41 = tpu.dynamic_rotate %40 by %c15_i32 dim 0 : vector<16x128xf32>, i32 -> vector<16x128xf32>
    %cst_15 = arith.constant 0.000000e+00 : f32
    %42 = vector.shape_cast %26 : vector<16x1xi1> to vector<16x1xi1>
    %43 = vector.broadcast %42 : vector<16x1xi1> to vector<16x128xi1>
    %44 = vector.broadcast %cst_15 : f32 to vector<16x128xf32>
    %45 = arith.select %43, %44, %41 : vector<16x128xi1>, vector<16x128xf32>
    %46 = arith.addf %38, %39 : vector<16x128xf32>
    %47 = arith.addf %46, %45 : vector<16x128xf32>
    %c0_16 = arith.constant 0 : index
    %c0_17 = arith.constant 0 : index
    %c0_18 = arith.constant 0 : index
    %48 = vector.load %arg4[%c0_16, %c0_17, %c0_18] : memref<6x1x128xf32, #tpu.memory_space<vmem>>, vector<1x1x128xf32>
    %49 = vector.shape_cast %48 : vector<1x1x128xf32> to vector<1x128xf32>
    %50 = vector.broadcast %49 : vector<1x128xf32> to vector<16x128xf32>
    %51 = arith.addf %47, %50 : vector<16x128xf32>
    %cst_19 = arith.constant 0.000000e+00 : f32
    %52 = vector.broadcast %cst_19 : f32 to vector<16x128xf32>
    %53 = arith.maximumf %51, %52 : vector<16x128xf32>
    %cst_20 = arith.constant 0.000000e+00 : f32
    %54 = vector.shape_cast %28 : vector<16x1xi1> to vector<16x1xi1>
    %55 = vector.broadcast %54 : vector<16x1xi1> to vector<16x128xi1>
    %56 = vector.broadcast %cst_20 : f32 to vector<16x128xf32>
    %57 = arith.select %55, %53, %56 : vector<16x128xi1>, vector<16x128xf32>
    %58 = vector.shape_cast %57 : vector<16x128xf32> to vector<2x8x128xf32>
    %cst_21 = arith.constant dense<0.000000e+00> : vector<2x128xf32>
    %59 = vector.multi_reduction <add>, %58, %cst_21 [1] : vector<2x8x128xf32> to vector<2x128xf32>
    %60 = vector.broadcast %2 : f32 to vector<2x128xf32>
    %61 = arith.mulf %59, %60 : vector<2x128xf32>
    %c0_22 = arith.constant 0 : index
    %c0_23 = arith.constant 0 : index
    %c0_24 = arith.constant 0 : index
    %62 = vector.load %arg5[%c0_22, %c0_23, %c0_24] : memref<3x128x128xf32, #tpu.memory_space<vmem>>, vector<1x128x128xf32>
    %63 = vector.shape_cast %62 : vector<1x128x128xf32> to vector<128x128xf32>
    %cst_25 = arith.constant dense<0.000000e+00> : vector<2x128xf32>
    %64 = tpu.matmul %61, %63, %cst_25 {dimension_numbers = #tpu.dot_dimension_numbers<[1], [0], [0], [1], [0, 0, 1, 1], [], []>} : vector<2x128xf32>, vector<128x128xf32>, vector<2x128xf32> -> vector<2x128xf32>
    %65 = arith.addf %29, %64 : vector<2x128xf32>
    %c1 = arith.constant 1 : index
    %c0_26 = arith.constant 0 : index
    %c0_27 = arith.constant 0 : index
    %66 = vector.load %arg3[%c1, %c0_26, %c0_27] : memref<6x128x384xf32, #tpu.memory_space<vmem>>, vector<1x128x384xf32>
    %67 = vector.shape_cast %66 : vector<1x128x384xf32> to vector<128x384xf32>
    %cst_28 = arith.constant dense<0.000000e+00> : vector<16x384xf32>
    %68 = tpu.matmul %4, %67, %cst_28 {dimension_numbers = #tpu.dot_dimension_numbers<[1], [0], [0], [1], [0, 0, 1, 1], [], []>} : vector<16x128xf32>, vector<128x384xf32>, vector<16x384xf32> -> vector<16x384xf32>
    %69 = vector.extract_strided_slice %68 {offsets = [0, 0], sizes = [16, 128], strides = [1, 1]} : vector<16x384xf32> to vector<16x128xf32>
    %c1_i32_29 = arith.constant 1 : i32
    %70 = tpu.dynamic_rotate %69 by %c1_i32_29 dim 0 : vector<16x128xf32>, i32 -> vector<16x128xf32>
    %cst_30 = arith.constant 0.000000e+00 : f32
    %71 = vector.shape_cast %23 : vector<16x1xi1> to vector<16x1xi1>
    %72 = vector.broadcast %71 : vector<16x1xi1> to vector<16x128xi1>
    %73 = vector.broadcast %cst_30 : f32 to vector<16x128xf32>
    %74 = arith.select %72, %73, %70 : vector<16x128xi1>, vector<16x128xf32>
    %75 = vector.extract_strided_slice %68 {offsets = [0, 128], sizes = [16, 128], strides = [1, 1]} : vector<16x384xf32> to vector<16x128xf32>
    %76 = vector.extract_strided_slice %68 {offsets = [0, 256], sizes = [16, 128], strides = [1, 1]} : vector<16x384xf32> to vector<16x128xf32>
    %c15_i32_31 = arith.constant 15 : i32
    %77 = tpu.dynamic_rotate %76 by %c15_i32_31 dim 0 : vector<16x128xf32>, i32 -> vector<16x128xf32>
    %cst_32 = arith.constant 0.000000e+00 : f32
    %78 = vector.shape_cast %26 : vector<16x1xi1> to vector<16x1xi1>
    %79 = vector.broadcast %78 : vector<16x1xi1> to vector<16x128xi1>
    %80 = vector.broadcast %cst_32 : f32 to vector<16x128xf32>
    %81 = arith.select %79, %80, %77 : vector<16x128xi1>, vector<16x128xf32>
    %82 = arith.addf %74, %75 : vector<16x128xf32>
    %83 = arith.addf %82, %81 : vector<16x128xf32>
    %c1_33 = arith.constant 1 : index
    %c0_34 = arith.constant 0 : index
    %c0_35 = arith.constant 0 : index
    %84 = vector.load %arg4[%c1_33, %c0_34, %c0_35] : memref<6x1x128xf32, #tpu.memory_space<vmem>>, vector<1x1x128xf32>
    %85 = vector.shape_cast %84 : vector<1x1x128xf32> to vector<1x128xf32>
    %86 = vector.broadcast %85 : vector<1x128xf32> to vector<16x128xf32>
    %87 = arith.addf %83, %86 : vector<16x128xf32>
    %cst_36 = arith.constant 0.000000e+00 : f32
    %88 = vector.broadcast %cst_36 : f32 to vector<16x128xf32>
    %89 = arith.maximumf %87, %88 : vector<16x128xf32>
    %c2 = arith.constant 2 : index
    %c0_37 = arith.constant 0 : index
    %c0_38 = arith.constant 0 : index
    %90 = vector.load %arg3[%c2, %c0_37, %c0_38] : memref<6x128x384xf32, #tpu.memory_space<vmem>>, vector<1x128x384xf32>
    %91 = vector.shape_cast %90 : vector<1x128x384xf32> to vector<128x384xf32>
    %cst_39 = arith.constant dense<0.000000e+00> : vector<16x384xf32>
    %92 = tpu.matmul %89, %91, %cst_39 {dimension_numbers = #tpu.dot_dimension_numbers<[1], [0], [0], [1], [0, 0, 1, 1], [], []>} : vector<16x128xf32>, vector<128x384xf32>, vector<16x384xf32> -> vector<16x384xf32>
    %93 = vector.extract_strided_slice %92 {offsets = [0, 0], sizes = [16, 128], strides = [1, 1]} : vector<16x384xf32> to vector<16x128xf32>
    %c1_i32_40 = arith.constant 1 : i32
    %94 = tpu.dynamic_rotate %93 by %c1_i32_40 dim 0 : vector<16x128xf32>, i32 -> vector<16x128xf32>
    %cst_41 = arith.constant 0.000000e+00 : f32
    %95 = vector.shape_cast %23 : vector<16x1xi1> to vector<16x1xi1>
    %96 = vector.broadcast %95 : vector<16x1xi1> to vector<16x128xi1>
    %97 = vector.broadcast %cst_41 : f32 to vector<16x128xf32>
    %98 = arith.select %96, %97, %94 : vector<16x128xi1>, vector<16x128xf32>
    %99 = vector.extract_strided_slice %92 {offsets = [0, 128], sizes = [16, 128], strides = [1, 1]} : vector<16x384xf32> to vector<16x128xf32>
    %100 = vector.extract_strided_slice %92 {offsets = [0, 256], sizes = [16, 128], strides = [1, 1]} : vector<16x384xf32> to vector<16x128xf32>
    %c15_i32_42 = arith.constant 15 : i32
    %101 = tpu.dynamic_rotate %100 by %c15_i32_42 dim 0 : vector<16x128xf32>, i32 -> vector<16x128xf32>
    %cst_43 = arith.constant 0.000000e+00 : f32
    %102 = vector.shape_cast %26 : vector<16x1xi1> to vector<16x1xi1>
    %103 = vector.broadcast %102 : vector<16x1xi1> to vector<16x128xi1>
    %104 = vector.broadcast %cst_43 : f32 to vector<16x128xf32>
    %105 = arith.select %103, %104, %101 : vector<16x128xi1>, vector<16x128xf32>
    %106 = arith.addf %98, %99 : vector<16x128xf32>
    %107 = arith.addf %106, %105 : vector<16x128xf32>
    %c2_44 = arith.constant 2 : index
    %c0_45 = arith.constant 0 : index
    %c0_46 = arith.constant 0 : index
    %108 = vector.load %arg4[%c2_44, %c0_45, %c0_46] : memref<6x1x128xf32, #tpu.memory_space<vmem>>, vector<1x1x128xf32>
    %109 = vector.shape_cast %108 : vector<1x1x128xf32> to vector<1x128xf32>
    %110 = vector.broadcast %109 : vector<1x128xf32> to vector<16x128xf32>
    %111 = arith.addf %107, %110 : vector<16x128xf32>
    %cst_47 = arith.constant 0.000000e+00 : f32
    %112 = vector.broadcast %cst_47 : f32 to vector<16x128xf32>
    %113 = arith.maximumf %111, %112 : vector<16x128xf32>
    %cst_48 = arith.constant 0.000000e+00 : f32
    %114 = vector.shape_cast %28 : vector<16x1xi1> to vector<16x1xi1>
    %115 = vector.broadcast %114 : vector<16x1xi1> to vector<16x128xi1>
    %116 = vector.broadcast %cst_48 : f32 to vector<16x128xf32>
    %117 = arith.select %115, %113, %116 : vector<16x128xi1>, vector<16x128xf32>
    %118 = vector.shape_cast %117 : vector<16x128xf32> to vector<2x8x128xf32>
    %cst_49 = arith.constant dense<0.000000e+00> : vector<2x128xf32>
    %119 = vector.multi_reduction <add>, %118, %cst_49 [1] : vector<2x8x128xf32> to vector<2x128xf32>
    %120 = vector.broadcast %2 : f32 to vector<2x128xf32>
    %121 = arith.mulf %119, %120 : vector<2x128xf32>
    %c1_50 = arith.constant 1 : index
    %c0_51 = arith.constant 0 : index
    %c0_52 = arith.constant 0 : index
    %122 = vector.load %arg5[%c1_50, %c0_51, %c0_52] : memref<3x128x128xf32, #tpu.memory_space<vmem>>, vector<1x128x128xf32>
    %123 = vector.shape_cast %122 : vector<1x128x128xf32> to vector<128x128xf32>
    %cst_53 = arith.constant dense<0.000000e+00> : vector<2x128xf32>
    %124 = tpu.matmul %121, %123, %cst_53 {dimension_numbers = #tpu.dot_dimension_numbers<[1], [0], [0], [1], [0, 0, 1, 1], [], []>} : vector<2x128xf32>, vector<128x128xf32>, vector<2x128xf32> -> vector<2x128xf32>
    %125 = arith.addf %65, %124 : vector<2x128xf32>
    %c3 = arith.constant 3 : index
    %c0_54 = arith.constant 0 : index
    %c0_55 = arith.constant 0 : index
    %126 = vector.load %arg3[%c3, %c0_54, %c0_55] : memref<6x128x384xf32, #tpu.memory_space<vmem>>, vector<1x128x384xf32>
    %127 = vector.shape_cast %126 : vector<1x128x384xf32> to vector<128x384xf32>
    %cst_56 = arith.constant dense<0.000000e+00> : vector<16x384xf32>
    %128 = tpu.matmul %4, %127, %cst_56 {dimension_numbers = #tpu.dot_dimension_numbers<[1], [0], [0], [1], [0, 0, 1, 1], [], []>} : vector<16x128xf32>, vector<128x384xf32>, vector<16x384xf32> -> vector<16x384xf32>
    %129 = vector.extract_strided_slice %128 {offsets = [0, 0], sizes = [16, 128], strides = [1, 1]} : vector<16x384xf32> to vector<16x128xf32>
    %c1_i32_57 = arith.constant 1 : i32
    %130 = tpu.dynamic_rotate %129 by %c1_i32_57 dim 0 : vector<16x128xf32>, i32 -> vector<16x128xf32>
    %cst_58 = arith.constant 0.000000e+00 : f32
    %131 = vector.shape_cast %23 : vector<16x1xi1> to vector<16x1xi1>
    %132 = vector.broadcast %131 : vector<16x1xi1> to vector<16x128xi1>
    %133 = vector.broadcast %cst_58 : f32 to vector<16x128xf32>
    %134 = arith.select %132, %133, %130 : vector<16x128xi1>, vector<16x128xf32>
    %135 = vector.extract_strided_slice %128 {offsets = [0, 128], sizes = [16, 128], strides = [1, 1]} : vector<16x384xf32> to vector<16x128xf32>
    %136 = vector.extract_strided_slice %128 {offsets = [0, 256], sizes = [16, 128], strides = [1, 1]} : vector<16x384xf32> to vector<16x128xf32>
    %c15_i32_59 = arith.constant 15 : i32
    %137 = tpu.dynamic_rotate %136 by %c15_i32_59 dim 0 : vector<16x128xf32>, i32 -> vector<16x128xf32>
    %cst_60 = arith.constant 0.000000e+00 : f32
    %138 = vector.shape_cast %26 : vector<16x1xi1> to vector<16x1xi1>
    %139 = vector.broadcast %138 : vector<16x1xi1> to vector<16x128xi1>
    %140 = vector.broadcast %cst_60 : f32 to vector<16x128xf32>
    %141 = arith.select %139, %140, %137 : vector<16x128xi1>, vector<16x128xf32>
    %142 = arith.addf %134, %135 : vector<16x128xf32>
    %143 = arith.addf %142, %141 : vector<16x128xf32>
    %c3_61 = arith.constant 3 : index
    %c0_62 = arith.constant 0 : index
    %c0_63 = arith.constant 0 : index
    %144 = vector.load %arg4[%c3_61, %c0_62, %c0_63] : memref<6x1x128xf32, #tpu.memory_space<vmem>>, vector<1x1x128xf32>
    %145 = vector.shape_cast %144 : vector<1x1x128xf32> to vector<1x128xf32>
    %146 = vector.broadcast %145 : vector<1x128xf32> to vector<16x128xf32>
    %147 = arith.addf %143, %146 : vector<16x128xf32>
    %cst_64 = arith.constant 0.000000e+00 : f32
    %148 = vector.broadcast %cst_64 : f32 to vector<16x128xf32>
    %149 = arith.maximumf %147, %148 : vector<16x128xf32>
    %c4 = arith.constant 4 : index
    %c0_65 = arith.constant 0 : index
    %c0_66 = arith.constant 0 : index
    %150 = vector.load %arg3[%c4, %c0_65, %c0_66] : memref<6x128x384xf32, #tpu.memory_space<vmem>>, vector<1x128x384xf32>
    %151 = vector.shape_cast %150 : vector<1x128x384xf32> to vector<128x384xf32>
    %cst_67 = arith.constant dense<0.000000e+00> : vector<16x384xf32>
    %152 = tpu.matmul %149, %151, %cst_67 {dimension_numbers = #tpu.dot_dimension_numbers<[1], [0], [0], [1], [0, 0, 1, 1], [], []>} : vector<16x128xf32>, vector<128x384xf32>, vector<16x384xf32> -> vector<16x384xf32>
    %153 = vector.extract_strided_slice %152 {offsets = [0, 0], sizes = [16, 128], strides = [1, 1]} : vector<16x384xf32> to vector<16x128xf32>
    %c1_i32_68 = arith.constant 1 : i32
    %154 = tpu.dynamic_rotate %153 by %c1_i32_68 dim 0 : vector<16x128xf32>, i32 -> vector<16x128xf32>
    %cst_69 = arith.constant 0.000000e+00 : f32
    %155 = vector.shape_cast %23 : vector<16x1xi1> to vector<16x1xi1>
    %156 = vector.broadcast %155 : vector<16x1xi1> to vector<16x128xi1>
    %157 = vector.broadcast %cst_69 : f32 to vector<16x128xf32>
    %158 = arith.select %156, %157, %154 : vector<16x128xi1>, vector<16x128xf32>
    %159 = vector.extract_strided_slice %152 {offsets = [0, 128], sizes = [16, 128], strides = [1, 1]} : vector<16x384xf32> to vector<16x128xf32>
    %160 = vector.extract_strided_slice %152 {offsets = [0, 256], sizes = [16, 128], strides = [1, 1]} : vector<16x384xf32> to vector<16x128xf32>
    %c15_i32_70 = arith.constant 15 : i32
    %161 = tpu.dynamic_rotate %160 by %c15_i32_70 dim 0 : vector<16x128xf32>, i32 -> vector<16x128xf32>
    %cst_71 = arith.constant 0.000000e+00 : f32
    %162 = vector.shape_cast %26 : vector<16x1xi1> to vector<16x1xi1>
    %163 = vector.broadcast %162 : vector<16x1xi1> to vector<16x128xi1>
    %164 = vector.broadcast %cst_71 : f32 to vector<16x128xf32>
    %165 = arith.select %163, %164, %161 : vector<16x128xi1>, vector<16x128xf32>
    %166 = arith.addf %158, %159 : vector<16x128xf32>
    %167 = arith.addf %166, %165 : vector<16x128xf32>
    %c4_72 = arith.constant 4 : index
    %c0_73 = arith.constant 0 : index
    %c0_74 = arith.constant 0 : index
    %168 = vector.load %arg4[%c4_72, %c0_73, %c0_74] : memref<6x1x128xf32, #tpu.memory_space<vmem>>, vector<1x1x128xf32>
    %169 = vector.shape_cast %168 : vector<1x1x128xf32> to vector<1x128xf32>
    %170 = vector.broadcast %169 : vector<1x128xf32> to vector<16x128xf32>
    %171 = arith.addf %167, %170 : vector<16x128xf32>
    %cst_75 = arith.constant 0.000000e+00 : f32
    %172 = vector.broadcast %cst_75 : f32 to vector<16x128xf32>
    %173 = arith.maximumf %171, %172 : vector<16x128xf32>
    %c5 = arith.constant 5 : index
    %c0_76 = arith.constant 0 : index
    %c0_77 = arith.constant 0 : index
    %174 = vector.load %arg3[%c5, %c0_76, %c0_77] : memref<6x128x384xf32, #tpu.memory_space<vmem>>, vector<1x128x384xf32>
    %175 = vector.shape_cast %174 : vector<1x128x384xf32> to vector<128x384xf32>
    %cst_78 = arith.constant dense<0.000000e+00> : vector<16x384xf32>
    %176 = tpu.matmul %173, %175, %cst_78 {dimension_numbers = #tpu.dot_dimension_numbers<[1], [0], [0], [1], [0, 0, 1, 1], [], []>} : vector<16x128xf32>, vector<128x384xf32>, vector<16x384xf32> -> vector<16x384xf32>
    %177 = vector.extract_strided_slice %176 {offsets = [0, 0], sizes = [16, 128], strides = [1, 1]} : vector<16x384xf32> to vector<16x128xf32>
    %c1_i32_79 = arith.constant 1 : i32
    %178 = tpu.dynamic_rotate %177 by %c1_i32_79 dim 0 : vector<16x128xf32>, i32 -> vector<16x128xf32>
    %cst_80 = arith.constant 0.000000e+00 : f32
    %179 = vector.shape_cast %23 : vector<16x1xi1> to vector<16x1xi1>
    %180 = vector.broadcast %179 : vector<16x1xi1> to vector<16x128xi1>
    %181 = vector.broadcast %cst_80 : f32 to vector<16x128xf32>
    %182 = arith.select %180, %181, %178 : vector<16x128xi1>, vector<16x128xf32>
    %183 = vector.extract_strided_slice %176 {offsets = [0, 128], sizes = [16, 128], strides = [1, 1]} : vector<16x384xf32> to vector<16x128xf32>
    %184 = vector.extract_strided_slice %176 {offsets = [0, 256], sizes = [16, 128], strides = [1, 1]} : vector<16x384xf32> to vector<16x128xf32>
    %c15_i32_81 = arith.constant 15 : i32
    %185 = tpu.dynamic_rotate %184 by %c15_i32_81 dim 0 : vector<16x128xf32>, i32 -> vector<16x128xf32>
    %cst_82 = arith.constant 0.000000e+00 : f32
    %186 = vector.shape_cast %26 : vector<16x1xi1> to vector<16x1xi1>
    %187 = vector.broadcast %186 : vector<16x1xi1> to vector<16x128xi1>
    %188 = vector.broadcast %cst_82 : f32 to vector<16x128xf32>
    %189 = arith.select %187, %188, %185 : vector<16x128xi1>, vector<16x128xf32>
    %190 = arith.addf %182, %183 : vector<16x128xf32>
    %191 = arith.addf %190, %189 : vector<16x128xf32>
    %c5_83 = arith.constant 5 : index
    %c0_84 = arith.constant 0 : index
    %c0_85 = arith.constant 0 : index
    %192 = vector.load %arg4[%c5_83, %c0_84, %c0_85] : memref<6x1x128xf32, #tpu.memory_space<vmem>>, vector<1x1x128xf32>
    %193 = vector.shape_cast %192 : vector<1x1x128xf32> to vector<1x128xf32>
    %194 = vector.broadcast %193 : vector<1x128xf32> to vector<16x128xf32>
    %195 = arith.addf %191, %194 : vector<16x128xf32>
    %cst_86 = arith.constant 0.000000e+00 : f32
    %196 = vector.broadcast %cst_86 : f32 to vector<16x128xf32>
    %197 = arith.maximumf %195, %196 : vector<16x128xf32>
    %cst_87 = arith.constant 0.000000e+00 : f32
    %198 = vector.shape_cast %28 : vector<16x1xi1> to vector<16x1xi1>
    %199 = vector.broadcast %198 : vector<16x1xi1> to vector<16x128xi1>
    %200 = vector.broadcast %cst_87 : f32 to vector<16x128xf32>
    %201 = arith.select %199, %197, %200 : vector<16x128xi1>, vector<16x128xf32>
    %202 = vector.shape_cast %201 : vector<16x128xf32> to vector<2x8x128xf32>
    %cst_88 = arith.constant dense<0.000000e+00> : vector<2x128xf32>
    %203 = vector.multi_reduction <add>, %202, %cst_88 [1] : vector<2x8x128xf32> to vector<2x128xf32>
    %204 = vector.broadcast %2 : f32 to vector<2x128xf32>
    %205 = arith.mulf %203, %204 : vector<2x128xf32>
    %c2_89 = arith.constant 2 : index
    %c0_90 = arith.constant 0 : index
    %c0_91 = arith.constant 0 : index
    %206 = vector.load %arg5[%c2_89, %c0_90, %c0_91] : memref<3x128x128xf32, #tpu.memory_space<vmem>>, vector<1x128x128xf32>
    %207 = vector.shape_cast %206 : vector<1x128x128xf32> to vector<128x128xf32>
    %cst_92 = arith.constant dense<0.000000e+00> : vector<2x128xf32>
    %208 = tpu.matmul %205, %207, %cst_92 {dimension_numbers = #tpu.dot_dimension_numbers<[1], [0], [0], [1], [0, 0, 1, 1], [], []>} : vector<2x128xf32>, vector<128x128xf32>, vector<2x128xf32> -> vector<2x128xf32>
    %209 = arith.addf %125, %208 : vector<2x128xf32>
    %c0_93 = arith.constant 0 : index
    %c0_94 = arith.constant 0 : index
    %210 = vector.load %arg6[%c0_93, %c0_94] : memref<1x128xf32, #tpu.memory_space<vmem>>, vector<1x128xf32>
    %211 = vector.broadcast %210 : vector<1x128xf32> to vector<2x128xf32>
    %212 = arith.addf %209, %211 : vector<2x128xf32>
    %c0_95 = arith.constant 0 : index
    %c0_96 = arith.constant 0 : index
    %213 = vector.load %arg7[%c0_95, %c0_96] : memref<2x128xf32, #tpu.memory_space<vmem>>, vector<2x128xf32>
    tpu.vector_store %arg7[%c0_95, %c0_96], %212 {strides = array<i32>} : memref<2x128xf32, #tpu.memory_space<vmem>>, vector<2x128xf32>,
    return
  }
  func.func @transform_0(%arg0: i32, %arg1: memref<1xi32, #tpu.memory_space<smem>>) -> (i32, i32, i32) {
    %c0_i32 = arith.constant 0 : i32
    %c0_i32_0 = arith.constant 0 : i32
    %c0_i32_1 = arith.constant 0 : i32
    return %arg0, %c0_i32, %c0_i32_0 : i32, i32, i32
  }
  func.func @transform_1(%arg0: i32, %arg1: memref<1xi32, #tpu.memory_space<smem>>) -> (i32, i32, i32) {
    %c0_i32 = arith.constant 0 : i32
    %c0_i32_0 = arith.constant 0 : i32
    %c0_i32_1 = arith.constant 0 : i32
    %c0_i32_2 = arith.constant 0 : i32
    return %c0_i32, %c0_i32_0, %c0_i32_1 : i32, i32, i32
  }
  func.func @transform_2(%arg0: i32, %arg1: memref<1xi32, #tpu.memory_space<smem>>) -> (i32, i32, i32) {
    %c0_i32 = arith.constant 0 : i32
    %c0_i32_0 = arith.constant 0 : i32
    %c0_i32_1 = arith.constant 0 : i32
    %c0_i32_2 = arith.constant 0 : i32
    return %c0_i32, %c0_i32_0, %c0_i32_1 : i32, i32, i32
  }
  func.func @transform_3(%arg0: i32, %arg1: memref<1xi32, #tpu.memory_space<smem>>) -> (i32, i32, i32) {
    %c0_i32 = arith.constant 0 : i32
    %c0_i32_0 = arith.constant 0 : i32
    %c0_i32_1 = arith.constant 0 : i32
    %c0_i32_2 = arith.constant 0 : i32
    return %c0_i32, %c0_i32_0, %c0_i32_1 : i32, i32, i32
  }
  func.func @transform_4(%arg0: i32, %arg1: memref<1xi32, #tpu.memory_space<smem>>) -> (i32, i32) {
    %c0_i32 = arith.constant 0 : i32
    %c0_i32_0 = arith.constant 0 : i32
    %c0_i32_1 = arith.constant 0 : i32
    return %c0_i32, %c0_i32_0 : i32, i32
  }
  func.func @transform_5(%arg0: i32, %arg1: memref<1xi32, #tpu.memory_space<smem>>) -> (i32, i32) {
    %c0_i32 = arith.constant 0 : i32
    %c0_i32_0 = arith.constant 0 : i32
    return %arg0, %c0_i32 : i32, i32
  }
}

</mosaic_0001>

<bundles_post_ra>
// kernel: tpu_custom_call.1
= control target key start
LH: loop header
LB: loop body
LE: loop exit
PB: predicated region body
PF: predicated region fallthrough
CT: control target
= control target key end

     0   :  { %12 = vsyncpa [#allocation5], 0  ;;  %s3313_s0 = inlined_call_operand.<no memory space> [shape: s32[1], index: 0, kind: input, shape index: {}]   ;;  %s3314_s1 = inlined_call_operand.hbm [shape: f32[2,8,128], index: 1, kind: input, shape index: {}]   ;;  %s3315_s2 = inlined_call_operand.hbm [shape: f32[6,128,384], index: 2, kind: input, shape index: {}]   ;;  %s3316_s3 = inlined_call_operand.hbm [shape: f32[6,1,128], index: 3, kind: input, shape index: {}]   ;;  %s3317_s4 = inlined_call_operand.hbm [shape: f32[3,128,128], index: 4, kind: input, shape index: {}]   ;;  %s3318_s5 = inlined_call_operand.hbm [shape: f32[1,128], index: 5, kind: input, shape index: {}]   ;;  %s3319_s6 = inlined_call_operand.hbm [shape: f32[2,128], index: 6, kind: output, shape index: {}]  }
   0x1   :  { %13 = vsyncpa [#allocation8], 0 }
   0x2   :  { %14 = vsyncpa [#allocation11], 0 }
   0x3   :  { %15 = vsyncpa [#allocation6], 0  ;;  %s2966_s21 = smov [#allocation7]   ;;  %s2826_s25 = scalar_lea.hbm %s3315_s2, 36864 }
   0x4   :  { %s33_s22 = sshll.u32 %s2966_s21, 4  ;;  %p2827_p0 = scmp.ne.s32.totalorder %s3315_s2, %s2826_s25  ;;  %s34_s22 = int_to_ptr.vmem [resolvable:$true] %s33_s22 }
   0x5   :  { %p2830_p1 = scmp.lt.u32.totalorder %s2826_s25, %s3315_s2 }
   0x7   :  { %p2832_p2 = pnand %p2830_p1, %p2827_p0 }
   0x9   :  { %2835 = shalt.err (!%p2832_p2)
}
   0xa   :  { %s2836_s30 = scalar_lea.vmem %s34_s22, 36864  ;;  %p2841_p4 = scmp.lt.s32.totalorder %s34_s22, %s34_s22 }
   0xb   :  { %p2837_p3 = scmp.ne.s32.totalorder %s34_s22, %s2836_s30  ;;  %p2842_p5 = scmp.lt.s32.totalorder %s2836_s30, %s2836_s30 }
   0xd   :  { %p2843_p6 = por %p2842_p5, %p2841_p4 }
   0xf   :  { %p2844_p7 = pnand %p2843_p6, %p2837_p3 }
  0x11   :  { %2847 = shalt.err (!%p2844_p7)
}
  0x12   :  { %s2967_s7 = smov 384   ;;  %s2968_s8 = smov 24  }
  0x13   :  { %39 = dma.hbm_to_vmem [thread:$0]  %s3315_s2, 36864, %s34_s22, [#allocation8], %s2967_s7, %s2967_s7, %s2968_s8  }
  0x14   :  { %s2969_s11 = smov [#allocation10]   ;;  %s2970_s13 = smov [#allocation4]  }
  0x15   :  { %s57_s12 = sshll.u32 %s2969_s11, 4  ;;  %s21_s14 = sshll.u32 %s2970_s13, 4  ;;  %s58_s12 = int_to_ptr.vmem [resolvable:$true] %s57_s12  ;;  %s22_s14 = int_to_ptr.vmem [resolvable:$true] %s21_s14 }
  0x16   :  { %s2848_s17 = scalar_lea.hbm %s3317_s4, 6144 }
  0x17   :  { %p2849_p8 = scmp.ne.s32.totalorder %s3317_s4, %s2848_s17  ;;  %p2852_p9 = scmp.lt.u32.totalorder %s2848_s17, %s3317_s4 }
  0x19   :  { %p2854_p10 = pnand %p2852_p9, %p2849_p8 }
  0x1b   :  { %2857 = shalt.err (!%p2854_p10)
}
  0x1c   :  { %s2858_s2 = scalar_lea.vmem %s58_s12, 6144  ;;  %p2863_p12 = scmp.lt.s32.totalorder %s58_s12, %s58_s12 }
  0x1d   :  { %p2859_p11 = scmp.ne.s32.totalorder %s58_s12, %s2858_s2  ;;  %p2864_p13 = scmp.lt.s32.totalorder %s2858_s2, %s2858_s2 }
  0x1f   :  { %p2865_p0 = por %p2864_p13, %p2863_p12 }
  0x21   :  { %p2866_p1 = pnand %p2865_p0, %p2859_p11 }
  0x23   :  { %2869 = shalt.err (!%p2866_p1)
}
  0x24   :  { %s2971_s22 = smov 128   ;;  %s2972_s23 = smov 8  }
  0x25   :  { %63 = dma.hbm_to_vmem [thread:$0]  %s3317_s4, 6144, %s58_s12, [#allocation11], %s2971_s22, %s2971_s22, %s2972_s23  }
  0x26   :  { %s2870_s28 = scalar_lea.hbm %s3314_s1, 256 }
  0x27   :  { %p2871_p2 = scmp.ne.s32.totalorder %s3314_s1, %s2870_s28  ;;  %p2874_p3 = scmp.lt.u32.totalorder %s2870_s28, %s3314_s1 }
  0x29   :  { %p2876_p4 = pnand %p2874_p3, %p2871_p2 }
  0x2b   :  { %2879 = shalt.err (!%p2876_p4)
}
  0x2c   :  { %s2880_s9 = scalar_lea.vmem %s22_s14, 256  ;;  %p2885_p6 = scmp.lt.s32.totalorder %s22_s14, %s22_s14 }
  0x2d   :  { %p2881_p5 = scmp.ne.s32.totalorder %s22_s14, %s2880_s9  ;;  %p2886_p7 = scmp.lt.s32.totalorder %s2880_s9, %s2880_s9 }
  0x2f   :  { %p2887_p8 = por %p2886_p7, %p2885_p6 }
  0x31   :  { %p2888_p9 = pnand %p2887_p8, %p2881_p5 }
  0x33   :  { %2891 = shalt.err (!%p2888_p9)
}
  0x34   :  { %27 = dma.hbm_to_vmem [thread:$0]  %s3314_s1, 256, %s22_s14, [#allocation5], %s2971_s22, %s2971_s22, %s2972_s23  }
  0x35   :  { %s2973_s11 = smov [#allocation9]   ;;  %s2892_s16 = scalar_lea.hbm %s3316_s3, 96 }
  0x36   :  { %s45_s12 = sshll.u32 %s2973_s11, 4  ;;  %p2893_p10 = scmp.ne.s32.totalorder %s3316_s3, %s2892_s16  ;;  %s46_s12 = int_to_ptr.vmem [resolvable:$true] %s45_s12 }
  0x37   :  { %p2896_p11 = scmp.lt.u32.totalorder %s2892_s16, %s3316_s3 }
  0x39   :  { %p2898_p12 = pnand %p2896_p11, %p2893_p10 }
  0x3b   :  { %2901 = shalt.err (!%p2898_p12)
}
  0x3c   :  { %s2902_s21 = scalar_lea.vmem %s46_s12, 96  ;;  %p2907_p0 = scmp.lt.s32.totalorder %s46_s12, %s46_s12 }
  0x3d   :  { %p2903_p13 = scmp.ne.s32.totalorder %s46_s12, %s2902_s21  ;;  %p2908_p1 = scmp.lt.s32.totalorder %s2902_s21, %s2902_s21 }
  0x3f   :  { %p2909_p2 = por %p2908_p1, %p2907_p0 }
  0x41   :  { %p2910_p3 = pnand %p2909_p2, %p2903_p13 }
  0x43   :  { %2913 = shalt.err (!%p2910_p3)
}
  0x44   :  { %s2974_s1 = smov 16   ;;  %s2975_s14 = smov 1  }
  0x45   :  { %51 = dma.hbm_to_vmem [thread:$0]  %s3316_s3, 96, %s46_s12, [#allocation8], %s2974_s1, %s2974_s1, %s2975_s14  }
  0x46   :  { %s2976_s23 = smov [#allocation12]   ;;  %s2914_s27 = scalar_lea.hbm %s3318_s5, 16 }
  0x47   :  { %s70_s24 = sshll.u32 %s2976_s23, 4  ;;  %p2915_p4 = scmp.ne.s32.totalorder %s3318_s5, %s2914_s27  ;;  %s71_s24 = int_to_ptr.vmem [resolvable:$true] %s70_s24 }
  0x48   :  { %p2918_p5 = scmp.lt.u32.totalorder %s2914_s27, %s3318_s5 }
  0x4a   :  { %p2920_p6 = pnand %p2918_p5, %p2915_p4 }
  0x4c   :  { %2923 = shalt.err (!%p2920_p6)
}
  0x4d   :  { %s2924_s8 = scalar_lea.vmem %s71_s24, 16  ;;  %s2928_s3 = scalar_lea.vmem %s71_s24, 32 }
  0x4e   :  { %p2925_p7 = scmp.ne.s32.totalorder %s71_s24, %s2924_s8  ;;  %p2929_p8 = scmp.lt.s32.totalorder %s71_s24, %s71_s24 }
  0x4f   :  { %p2930_p9 = scmp.lt.s32.totalorder %s2928_s3, %s2924_s8 }
  0x51   :  { %p2931_p10 = por %p2930_p9, %p2929_p8 }
  0x53   :  { %p2932_p11 = pnand %p2931_p10, %p2925_p7 }
  0x55   :  { %2935 = shalt.err (!%p2932_p11)
}
  0x56   :  { %73 = dma.hbm_to_vmem [thread:$0]  %s3318_s5, 16, %s71_s24, [#allocation11]  }
  0x57   :  { %2958 = dma.done.wait [#allocation5], 256  }
  0x58   :  { %2959 = vsyncadd [#allocation5], 4294967040 }
  0x59   :  { %2960 = dma.done.wait [#allocation8], 36960  }
  0x5a   :  { %2961 = vsyncadd [#allocation8], 4294930336 }
  0x5b   :  { %2962 = dma.done.wait [#allocation11], 6160  }
  0x5c   :  { %2963 = vsyncadd [#allocation11], 4294961136  ;;  %s90_s12 = scvt.s32.f32 %s3313_s0  ;;  %v2977_v0 = vmov 0.0   ;;  %v133_v2 = vld [vmem:[#allocation7 + $0x8] sm:$0xff]  ;;  %v136_v3 = vld [vmem:[#allocation7 + $0x20] sm:$0xff]  ;;  %s1867_s15 = sadd.s32 4294967295, %s3313_s0 }
  0x5d   :  { %244 = vmatprep.mubr.f32.mxu0 %v2977_v0  ;;  %v132_v4 = vld [vmem:[#allocation7] sm:$0xff]  ;;  %v2349_v5 = vpack.c.bf16 %v136_v3, %v133_v2  ;;  %v135_v6 = vld [vmem:[#allocation7 + $0x18] sm:$0xff]  ;;  %v142_v8 = vld [vmem:[#allocation7 + $0x50] sm:$0xff]  ;;  %vm899_vm8 = vcmask 1041409   ;;  %vm2979_vm9 = vmmov 0   ;;  %s2980_s18 = smov [#allocation13]  }
  0x5e   :  { %v91_v1 = vstv %s90_s12  ;;  %v139_v7 = vld [vmem:[#allocation7 + $0x38] sm:$0xff]  ;;  %v2351_v9 = vpack.c.bf16 %v135_v6, %v132_v4  ;;  %v134_v11 = vld [vmem:[#allocation7 + $0x10] sm:$0xff]  ;;  %v137_v12 = vld [vmem:[#allocation7 + $0x28] sm:$0xff]  ;;  %s1856_s19 = sshll.u32 %s2980_s18, 4  ;;  %s1857_s19 = int_to_ptr.vmem [resolvable:$true] %s1856_s19 }
  0x5f   :  { %2822 = vrcp.f32 %v91_v1  ;;  %v2353_v10 = vpack.c.bf16 %v142_v8, %v139_v7  ;;  %v138_v13 = vld [vmem:[#allocation7 + $0x30] sm:$0xff]  ;;  %2350 = vmatprep.subr.bf16.mxu0 %v2349_v5  ;;  %v2381_v14 = vpack.c.bf16 %v137_v12, %v134_v11  ;;  %v141_v15 = vld [vmem:[#allocation7 + $0x48] sm:$0xff]  ;;  %v148_v17 = vld [vmem:[#allocation7 + $0x80] sm:$0xff]  ;;  %s2936_s20 = scalar_lea.vmem %s1857_s19, 32  ;;  %p2941_p13 = scmp.lt.s32.totalorder %s1857_s19, %s1857_s19 }
  0x60   :  { %v145_v16 = vld [vmem:[#allocation7 + $0x68] sm:$0xff]  ;;  %2352 = vmatpush1.bf16.msra.mxu0 %v2351_v9  ;;  %v2355_v18 = vpack.c.bf16 %v141_v15, %v138_v13  ;;  %v140_v19 = vld [vmem:[#allocation7 + $0x40] sm:$0xff]  ;;  %v143_v20 = vld [vmem:[#allocation7 + $0x58] sm:$0xff]  ;;  %p2937_p12 = scmp.ne.s32.totalorder %s1857_s19, %s2936_s20  ;;  %p2942_p0 = scmp.lt.s32.totalorder %s2936_s20, %s2936_s20 }
  0x61   :  { %2354 = vmatprep.subr.bf16.mxu0 %v2353_v10  ;;  %2382 = vmatprep.subr.bf16.mxu1 %v2381_v14  ;;  %v2357_v21 = vpack.c.bf16 %v148_v17, %v145_v16  ;;  %v2385_v22 = vpack.c.bf16 %v143_v20, %v140_v19  ;;  %v144_v23 = vld [vmem:[#allocation7 + $0x60] sm:$0xff]  ;;  %v147_v24 = vld [vmem:[#allocation7 + $0x78] sm:$0xff]  ;;  %v154_v27 = vld [vmem:[#allocation7 + $0xb0] sm:$0xff] }
  0x62   :  { %v151_v25 = vld [vmem:[#allocation7 + $0x98] sm:$0xff]  ;;  %2384 = vmatpush3.bf16.msra.mxu1 %v2381_v14  ;;  %v146_v28 = vld [vmem:[#allocation7 + $0x70] sm:$0xff]  ;;  %v149_v29 = vld [vmem:[#allocation7 + $0x88] sm:$0xff]  ;;  %v2359_v31 = vpack.c.bf16 %v147_v24, %v144_v23  ;;  %p2943_p1 = por %p2942_p0, %p2941_p13 }
  0x63   :  { %2386 = vmatprep.subr.bf16.mxu1 %v2385_v22  ;;  %v2389_v30 = vpack.c.bf16 %v149_v29, %v146_v28  ;;  %v152_v32 = vld [vmem:[#allocation7 + $0xa0] sm:$0xff]  ;;  %v155_v33 = vld [vmem:[#allocation7 + $0xb8] sm:$0xff]  ;;  %v2361_v34 = vpack.c.bf16 %v154_v27, %v151_v25  ;;  %v150_v35 = vld [vmem:[#allocation7 + $0x90] sm:$0xff] }
  0x64   :  { %2356 = vmatpush1.bf16.msra.mxu0 %v2355_v18  ;;  %v153_v36 = vld [vmem:[#allocation7 + $0xa8] sm:$0xff]  ;;  %v160_v38 = vld [vmem:[#allocation7 + $0xe0] sm:$0xff]  ;;  %v2393_v39 = vpack.c.bf16 %v155_v33, %v152_v32  ;;  %v158_v41 = vld [vmem:[#allocation7 + $0xd0] sm:$0xff]  ;;  %p2944_p2 = pnand %p2943_p1, %p2937_p12 }
  0x65   :  { %2358 = vmatprep.subr.bf16.mxu0 %v2357_v21  ;;  %v157_v37 = vld [vmem:[#allocation7 + $0xc8] sm:$0xff]  ;;  %v2363_v40 = vpack.c.bf16 %v153_v36, %v150_v35  ;;  %v156_v44 = vld [vmem:[#allocation7 + $0xc0] sm:$0xff]  ;;  %v159_v45 = vld [vmem:[#allocation7 + $0xd8] sm:$0xff] }
  0x66   :  { %2388 = vmatpush3.bf16.msra.mxu1 %v2385_v22  ;;  %v161_v42 = vld [vmem:[#allocation7 + $0xe8] sm:$0xff]  ;;  %v2365_v43 = vpack.c.bf16 %v160_v38, %v157_v37  ;;  %v163_v46 = vld [vmem:[#allocation7 + $0xf8] sm:$0xff]  ;;  %v166_v47 = vld [vmem:[#allocation7 + $0x110] sm:$0xff]  ;;  %v2367_v50 = vpack.c.bf16 %v159_v45, %v156_v44 }
  0x67   :  { %2390 = vmatprep.subr.bf16.mxu1 %v2389_v30  ;;  %v2397_v48 = vpack.c.bf16 %v161_v42, %v158_v41  ;;  %v3080_v49 = vld [vmem:[#allocation4] sm:$0xff]  ;;  %v164_v51 = vld [vmem:[#allocation7 + $0x100] sm:$0xff]  ;;  %v167_v52 = vld [vmem:[#allocation7 + $0x118] sm:$0xff]  ;;  %v2369_v53 = vpack.c.bf16 %v166_v47, %v163_v46 }
  0x68   :  { %2360 = vmatpush1.bf16.msra.mxu0 %v2359_v31  ;;  %2066 = vmatprep.mubr.f32.mxu1 %v3080_v49  ;;  %v162_v54 = vld [vmem:[#allocation7 + $0xf0] sm:$0xff]  ;;  %v165_v55 = vld [vmem:[#allocation7 + $0x108] sm:$0xff]  ;;  %v172_v57 = vld [vmem:[#allocation7 + $0x140] sm:$0xff]  ;;  %v2401_v58 = vpack.c.bf16 %v167_v52, %v164_v51 }
  0x69   :  { %v2823_v26 = vpop.eup %2822  ;;  %2362 = vmatprep.subr.bf16.mxu0 %v2361_v34  ;;  %v169_v56 = vld [vmem:[#allocation7 + $0x128] sm:$0xff]  ;;  %v2371_v59 = vpack.c.bf16 %v165_v55, %v162_v54  ;;  %v170_v60 = vld [vmem:[#allocation7 + $0x130] sm:$0xff]  ;;  %v168_v63 = vld [vmem:[#allocation7 + $0x120] sm:$0xff] }
  0x6a   :  { %2805 = vpush %v2823_v26  ;;  %2392 = vmatpush3.bf16.msra.mxu1 %v2389_v30  ;;  %v173_v61 = vld [vmem:[#allocation7 + $0x148] sm:$0xff]  ;;  %v2373_v62 = vpack.c.bf16 %v172_v57, %v169_v56  ;;  %v171_v1 = vld [vmem:[#allocation7 + $0x138] sm:$0xff]  ;;  %v178_v3 = vld [vmem:[#allocation7 + $0x170] sm:$0xff] }
  0x6b   :  { %2394 = vmatprep.subr.bf16.mxu1 %v2393_v39  ;;  %v175_v2 = vld [vmem:[#allocation7 + $0x158] sm:$0xff]  ;;  %v2405_v4 = vpack.c.bf16 %v173_v61, %v170_v60  ;;  %v2375_v5 = vpack.c.bf16 %v171_v1, %v168_v63  ;;  %v176_v6 = vld [vmem:[#allocation7 + $0x160] sm:$0xff]  ;;  %v174_v9 = vld [vmem:[#allocation7 + $0x150] sm:$0xff] }
  0x6c   :  { %2364 = vmatpush1.bf16.msra.mxu0 %v2363_v40  ;;  %v179_v7 = vld [vmem:[#allocation7 + $0x178] sm:$0xff]  ;;  %v2377_v8 = vpack.c.bf16 %v178_v3, %v175_v2  ;;  %v177_v10 = vld [vmem:[#allocation7 + $0x168] sm:$0xff]  ;;  %v411_v12 = vld [vmem:[#allocation7 + $0x1a0] sm:$0xff] }
  0x6d   :  { %2366 = vmatprep.subr.bf16.mxu0 %v2365_v43  ;;  %v408_v11 = vld [vmem:[#allocation7 + $0x188] sm:$0xff]  ;;  %v2409_v13 = vpack.c.bf16 %v179_v7, %v176_v6  ;;  %v2379_v14 = vpack.c.bf16 %v177_v10, %v174_v9  ;;  %v409_v15 = vld [vmem:[#allocation7 + $0x190] sm:$0xff]  ;;  %v407_v18 = vld [vmem:[#allocation7 + $0x180] sm:$0xff] }
  0x6e   :  { %2396 = vmatpush3.bf16.msra.mxu1 %v2393_v39  ;;  %v412_v16 = vld [vmem:[#allocation7 + $0x1a8] sm:$0xff]  ;;  %v2413_v17 = vpack.c.bf16 %v411_v12, %v408_v11  ;;  %v410_v19 = vld [vmem:[#allocation7 + $0x198] sm:$0xff]  ;;  %v417_v21 = vld [vmem:[#allocation7 + $0x1d0] sm:$0xff] }
  0x6f   :  { %2398 = vmatprep.subr.bf16.mxu1 %v2397_v48  ;;  %v414_v20 = vld [vmem:[#allocation7 + $0x1b8] sm:$0xff]  ;;  %v2445_v22 = vpack.c.bf16 %v412_v16, %v409_v15  ;;  %v2415_v23 = vpack.c.bf16 %v410_v19, %v407_v18  ;;  %v415_v24 = vld [vmem:[#allocation7 + $0x1c0] sm:$0xff]  ;;  %v413_v27 = vld [vmem:[#allocation7 + $0x1b0] sm:$0xff] }
  0x70   :  { %2368 = vmatpush1.bf16.msra.mxu0 %v2367_v50  ;;  %v418_v25 = vld [vmem:[#allocation7 + $0x1d8] sm:$0xff]  ;;  %v2417_v26 = vpack.c.bf16 %v417_v21, %v414_v20  ;;  %v416_v28 = vld [vmem:[#allocation7 + $0x1c8] sm:$0xff]  ;;  %v423_v31 = vld [vmem:[#allocation7 + $0x200] sm:$0xff] }
  0x71   :  { %2370 = vmatprep.subr.bf16.mxu0 %v2369_v53  ;;  %v3083_v29 = vld [vmem:[#allocation4 + $0x8] sm:$0xff]  ;;  %v420_v30 = vld [vmem:[#allocation7 + $0x1e8] sm:$0xff]  ;;  %v2449_v32 = vpack.c.bf16 %v418_v25, %v415_v24  ;;  %v2419_v33 = vpack.c.bf16 %v416_v28, %v413_v27  ;;  %v421_v34 = vld [vmem:[#allocation7 + $0x1f0] sm:$0xff] }
  0x72   :  { %2400 = vmatpush3.bf16.msra.mxu1 %v2397_v48  ;;  %v424_v35 = vld [vmem:[#allocation7 + $0x208] sm:$0xff]  ;;  %v2421_v36 = vpack.c.bf16 %v423_v31, %v420_v30  ;;  %v419_v37 = vld [vmem:[#allocation7 + $0x1e0] sm:$0xff]  ;;  %v422_v38 = vld [vmem:[#allocation7 + $0x1f8] sm:$0xff] }
  0x73   :  { %2402 = vmatprep.subr.bf16.mxu1 %v2401_v58  ;;  %v426_v39 = vld [vmem:[#allocation7 + $0x218] sm:$0xff]  ;;  %v429_v40 = vld [vmem:[#allocation7 + $0x230] sm:$0xff]  ;;  %v2453_v41 = vpack.c.bf16 %v424_v35, %v421_v34  ;;  %v2423_v42 = vpack.c.bf16 %v422_v38, %v419_v37  ;;  %v427_v43 = vld [vmem:[#allocation7 + $0x220] sm:$0xff] }
  0x74   :  { %2372 = vmatpush1.bf16.msra.mxu0 %v2371_v59  ;;  %v430_v44 = vld [vmem:[#allocation7 + $0x238] sm:$0xff]  ;;  %v2425_v45 = vpack.c.bf16 %v429_v40, %v426_v39  ;;  %v425_v46 = vld [vmem:[#allocation7 + $0x210] sm:$0xff]  ;;  %v428_v47 = vld [vmem:[#allocation7 + $0x228] sm:$0xff] }
  0x75   :  { %2374 = vmatprep.subr.bf16.mxu0 %v2373_v62  ;;  %v432_v48 = vld [vmem:[#allocation7 + $0x248] sm:$0xff]  ;;  %v435_v50 = vld [vmem:[#allocation7 + $0x260] sm:$0xff]  ;;  %v2457_v51 = vpack.c.bf16 %v430_v44, %v427_v43  ;;  %v2427_v52 = vpack.c.bf16 %v428_v47, %v425_v46  ;;  %v433_v53 = vld [vmem:[#allocation7 + $0x250] sm:$0xff] }
  0x76   :  { %2404 = vmatpush3.bf16.msra.mxu1 %v2401_v58  ;;  %v436_v54 = vld [vmem:[#allocation7 + $0x268] sm:$0xff]  ;;  %v2429_v55 = vpack.c.bf16 %v435_v50, %v432_v48  ;;  %v431_v56 = vld [vmem:[#allocation7 + $0x240] sm:$0xff]  ;;  %v434_v57 = vld [vmem:[#allocation7 + $0x258] sm:$0xff] }
  0x77   :  { %2406 = vmatprep.subr.bf16.mxu1 %v2405_v4  ;;  %v438_v58 = vld [vmem:[#allocation7 + $0x278] sm:$0xff]  ;;  %v441_v59 = vld [vmem:[#allocation7 + $0x290] sm:$0xff]  ;;  %v2461_v60 = vpack.c.bf16 %v436_v54, %v433_v53  ;;  %v2431_v61 = vpack.c.bf16 %v434_v57, %v431_v56  ;;  %v439_v62 = vld [vmem:[#allocation7 + $0x280] sm:$0xff] }
  0x78   :  { %2376 = vmatpush1.bf16.msra.mxu0 %v2375_v5  ;;  %v442_v63 = vld [vmem:[#allocation7 + $0x298] sm:$0xff]  ;;  %v2433_v1 = vpack.c.bf16 %v441_v59, %v438_v58  ;;  %v437_v2 = vld [vmem:[#allocation7 + $0x270] sm:$0xff]  ;;  %v440_v3 = vld [vmem:[#allocation7 + $0x288] sm:$0xff] }
  0x79   :  { %2378 = vmatprep.subr.bf16.mxu0 %v2377_v8  ;;  %v447_v5 = vld [vmem:[#allocation7 + $0x2c0] sm:$0xff]  ;;  %v2465_v6 = vpack.c.bf16 %v442_v63, %v439_v62  ;;  %v2435_v7 = vpack.c.bf16 %v440_v3, %v437_v2  ;;  %v445_v8 = vld [vmem:[#allocation7 + $0x2b0] sm:$0xff]  ;;  %v448_v9 = vld [vmem:[#allocation7 + $0x2c8] sm:$0xff] }
  0x7a   :  { %2408 = vmatpush3.bf16.msra.mxu1 %v2405_v4  ;;  %v444_v4 = vld [vmem:[#allocation7 + $0x2a8] sm:$0xff]  ;;  %v443_v11 = vld [vmem:[#allocation7 + $0x2a0] sm:$0xff]  ;;  %v446_v12 = vld [vmem:[#allocation7 + $0x2b8] sm:$0xff]  ;;  %v2469_v15 = vpack.c.bf16 %v448_v9, %v445_v8 }
  0x7b   :  { %2410 = vmatprep.subr.bf16.mxu1 %v2409_v13  ;;  %v2437_v10 = vpack.c.bf16 %v447_v5, %v444_v4  ;;  %v2439_v16 = vpack.c.bf16 %v446_v12, %v443_v11  ;;  %v454_v18 = vld [vmem:[#allocation7 + $0x2f8] sm:$0xff]  ;;  %v449_v20 = vld [vmem:[#allocation7 + $0x2d0] sm:$0xff]  ;;  %v452_v21 = vld [vmem:[#allocation7 + $0x2e8] sm:$0xff] }
  0x7c   :  { %2380 = vmatpush1.bf16.msra.mxu0 %v2379_v14  ;;  %v453_v14 = vld [vmem:[#allocation7 + $0x2f0] sm:$0xff]  ;;  %v637_v24 = vld [vmem:[#allocation7 + $0x308] sm:$0xff]  ;;  %v640_v25 = vld [vmem:[#allocation7 + $0x320] sm:$0xff] }
  0x7d   :  { %2414 = vmatprep.subr.bf16.mxu0 %v2413_v17  ;;  %v451_v17 = vld [vmem:[#allocation7 + $0x2e0] sm:$0xff]  ;;  %v2477_v27 = vpack.c.bf16 %v640_v25, %v637_v24  ;;  %v641_v28 = vld [vmem:[#allocation7 + $0x328] sm:$0xff]  ;;  %v639_v31 = vld [vmem:[#allocation7 + $0x318] sm:$0xff] }
  0x7e   :  { %2412 = vmatpush3.bf16.msra.mxu1 %v2409_v13  ;;  %v450_v13 = vld [vmem:[#allocation7 + $0x2d8] sm:$0xff]  ;;  %v636_v30 = vld [vmem:[#allocation7 + $0x300] sm:$0xff]  ;;  %v646_v35 = vld [vmem:[#allocation7 + $0x350] sm:$0xff] }
  0x7f   :  { %245 = vmatmul.mubr.f32.vlgmr.msra.gmra.mrb[0].mxu0 %v3080_v49  ;;  %2446 = vmatprep.subr.bf16.mxu1 %v2445_v22  ;;  %v2441_v19 = vpack.c.bf16 %v453_v14, %v450_v13  ;;  %v643_v34 = vld [vmem:[#allocation7 + $0x338] sm:$0xff]  ;;  %v642_v39 = vld [vmem:[#allocation7 + $0x330] sm:$0xff]  ;;  %v645_v40 = vld [vmem:[#allocation7 + $0x348] sm:$0xff] }
  0x80   :  { %2416 = vmatpush1.bf16.msra.mxu0 %v2415_v23  ;;  %250 = vmatprep.mubr.f32.mxu0 %v2977_v0  ;;  %v2443_v23 = vpack.c.bf16 %v452_v21, %v449_v20  ;;  %v2481_v37 = vpack.c.bf16 %v646_v35, %v643_v34  ;;  %v647_v38 = vld [vmem:[#allocation7 + $0x358] sm:$0xff]  ;;  %v649_v43 = vld [vmem:[#allocation7 + $0x368] sm:$0xff]  ;;  %v652_v44 = vld [vmem:[#allocation7 + $0x380] sm:$0xff] }
  0x81   :  { %2418 = vmatprep.subr.bf16.mxu0 %v2417_v26  ;;  %2067 = vmatmul.mubr.f32.vlgmr.msra.gmra.mrb[0].mxu1 %v3083_v29  ;;  %v638_v26 = vld [vmem:[#allocation7 + $0x310] sm:$0xff]  ;;  %v2485_v46 = vpack.c.bf16 %v652_v44, %v649_v43  ;;  %v653_v47 = vld [vmem:[#allocation7 + $0x388] sm:$0xff]  ;;  %v648_v48 = vld [vmem:[#allocation7 + $0x360] sm:$0xff] }
  0x82   :  { %2448 = vmatpush3.bf16.msra.mxu1 %v2445_v22  ;;  %2101 = vmatprep.mubr.f32.mxu1 %v3080_v49  ;;  %v2473_v22 = vpack.c.bf16 %v454_v18, %v451_v17  ;;  %v651_v50 = vld [vmem:[#allocation7 + $0x378] sm:$0xff]  ;;  %v658_v54 = vld [vmem:[#allocation7 + $0x3b0] sm:$0xff]  ;;  %v657_v59 = vld [vmem:[#allocation7 + $0x3a8] sm:$0xff] }
  0x83   :  { %251 = vmatmul.mubr.f32.gmra.mrb[2].mxu0 %v3083_v29  ;;  %2450 = vmatprep.subr.bf16.mxu1 %v2449_v32  ;;  %v655_v53 = vld [vmem:[#allocation7 + $0x398] sm:$0xff]  ;;  %v654_v58 = vld [vmem:[#allocation7 + $0x390] sm:$0xff]  ;;  %v661_v62 = vld [vmem:[#allocation7 + $0x3c8] sm:$0xff] }
  0x84   :  { %2420 = vmatpush1.bf16.msra.mxu0 %v2419_v33  ;;  %519 = vmatprep.mubr.f32.mxu0 %v2977_v0  ;;  %v2479_v33 = vpack.c.bf16 %v639_v31, %v636_v30  ;;  %v2489_v56 = vpack.c.bf16 %v658_v54, %v655_v53  ;;  %v659_v57 = vld [vmem:[#allocation7 + $0x3b8] sm:$0xff]  ;;  %v664_v63 = vld [vmem:[#allocation7 + $0x3e0] sm:$0xff]  ;;  %v665_v3 = vld [vmem:[#allocation7 + $0x3e8] sm:$0xff] }
  0x85   :  { %2422 = vmatprep.subr.bf16.mxu0 %v2421_v36  ;;  %v644_v36 = vld [vmem:[#allocation7 + $0x340] sm:$0xff]  ;;  %v2493_v2 = vpack.c.bf16 %v664_v63, %v661_v62  ;;  %v663_v5 = vld [vmem:[#allocation7 + $0x3d8] sm:$0xff]  ;;  %v670_v9 = vld [vmem:[#allocation7 + $0x410] sm:$0xff] }
  0x86   :  { %2452 = vmatpush3.bf16.msra.mxu1 %v2449_v32  ;;  %v2509_v32 = vpack.c.bf16 %v641_v28, %v638_v26  ;;  %v660_v4 = vld [vmem:[#allocation7 + $0x3c0] sm:$0xff]  ;;  %v667_v8 = vld [vmem:[#allocation7 + $0x3f8] sm:$0xff]  ;;  %v666_v13 = vld [vmem:[#allocation7 + $0x3f0] sm:$0xff] }
  0x87   :  { %2454 = vmatprep.subr.bf16.mxu1 %v2453_v41  ;;  %v2497_v11 = vpack.c.bf16 %v670_v9, %v667_v8  ;;  %v671_v12 = vld [vmem:[#allocation7 + $0x418] sm:$0xff]  ;;  %v669_v14 = vld [vmem:[#allocation7 + $0x408] sm:$0xff]  ;;  %v676_v18 = vld [vmem:[#allocation7 + $0x440] sm:$0xff] }
  0x88   :  { %2424 = vmatpush1.bf16.msra.mxu0 %v2423_v42  ;;  %v2483_v42 = vpack.c.bf16 %v645_v40, %v642_v39  ;;  %v673_v17 = vld [vmem:[#allocation7 + $0x428] sm:$0xff]  ;;  %v679_v26 = vld [vmem:[#allocation7 + $0x458] sm:$0xff]  ;;  %v680_v28 = vld [vmem:[#allocation7 + $0x460] sm:$0xff] }
  0x89   :  { %2426 = vmatprep.subr.bf16.mxu0 %v2425_v45  ;;  %v650_v45 = vld [vmem:[#allocation7 + $0x370] sm:$0xff]  ;;  %v2501_v20 = vpack.c.bf16 %v676_v18, %v673_v17  ;;  %v677_v21 = vld [vmem:[#allocation7 + $0x448] sm:$0xff]  ;;  %v683_v31 = vld [vmem:[#allocation7 + $0x478] sm:$0xff] }
  0x8a   :  { %2456 = vmatpush3.bf16.msra.mxu1 %v2453_v41  ;;  %v2513_v41 = vpack.c.bf16 %v647_v38, %v644_v36  ;;  %v681_v34 = vld [vmem:[#allocation7 + $0x468] sm:$0xff]  ;;  %v2978_v36 = vmov 0.0|0.0  }
  0x8b   :  { %2458 = vmatprep.subr.bf16.mxu1 %v2457_v51 }
  0x8c   :  { %2428 = vmatpush1.bf16.msra.mxu0 %v2427_v52  ;;  %v2487_v52 = vpack.c.bf16 %v651_v50, %v648_v48 }
  0x8d   :  { %2430 = vmatprep.subr.bf16.mxu0 %v2429_v55  ;;  %v656_v55 = vld [vmem:[#allocation7 + $0x3a0] sm:$0xff] }
  0x8e   :  { %2460 = vmatpush3.bf16.msra.mxu1 %v2457_v51  ;;  %v2517_v51 = vpack.c.bf16 %v653_v47, %v650_v45  ;;  %v126_v45 = vstv %s1867_s15 }
  0x8f   :  { %2462 = vmatprep.subr.bf16.mxu1 %v2461_v60 }
  0x90   :  { %2432 = vmatpush1.bf16.msra.mxu0 %v2431_v61  ;;  %v2491_v61 = vpack.c.bf16 %v657_v59, %v654_v58 }
  0x91   :  { %2434 = vmatprep.subr.bf16.mxu0 %v2433_v1  ;;  %v662_v1 = vld [vmem:[#allocation7 + $0x3d0] sm:$0xff] }
  0x92   :  { %2464 = vmatpush3.bf16.msra.mxu1 %v2461_v60  ;;  %v2521_v60 = vpack.c.bf16 %v659_v57, %v656_v55 }
  0x93   :  { %2466 = vmatprep.subr.bf16.mxu1 %v2465_v6 }
  0x94   :  { %2436 = vmatpush1.bf16.msra.mxu0 %v2435_v7  ;;  %v2495_v7 = vpack.c.bf16 %v663_v5, %v660_v4  ;;  %v129_v5 = vstv %s3313_s0 }
  0x95   :  { %2438 = vmatprep.subr.bf16.mxu0 %v2437_v10  ;;  %v668_v10 = vld [vmem:[#allocation7 + $0x400] sm:$0xff] }
  0x96   :  { %2468 = vmatpush3.bf16.msra.mxu1 %v2465_v6  ;;  %v2525_v6 = vpack.c.bf16 %v665_v3, %v662_v1  ;;  %v1868_v3 = vld [vmem:[#allocation9] ss:$0 sm:$0xff] }
  0x97   :  { %2470 = vmatprep.subr.bf16.mxu1 %v2469_v15 }
  0x98   :  { %2440 = vmatpush1.bf16.msra.mxu0 %v2439_v16  ;;  %v2499_v16 = vpack.c.bf16 %v669_v14, %v666_v13 }
  0x99   :  { %2442 = vmatprep.subr.bf16.mxu0 %v2441_v19  ;;  %v674_v19 = vld [vmem:[#allocation7 + $0x430] sm:$0xff] }
  0x9a   :  { %2472 = vmatpush3.bf16.msra.mxu1 %v2469_v15  ;;  %v2529_v15 = vpack.c.bf16 %v671_v12, %v668_v10  ;;  %v2533_v24 = vpack.c.bf16 %v677_v21, %v674_v19 }
  0x9b   :  { %2474 = vmatprep.subr.bf16.mxu1 %v2473_v22  ;;  %s2806_s0 = spop %2805 }
  0x9c   :  { %2444 = vmatpush1.bf16.msra.mxu0 %v2443_v23  ;;  %v675_v23 = vld [vmem:[#allocation7 + $0x438] sm:$0xff] }
  0x9d   :  { %2478 = vmatprep.subr.bf16.mxu0 %v2477_v27  ;;  %v682_v27 = vld [vmem:[#allocation7 + $0x470] sm:$0xff] }
  0x9e   :  { %2476 = vmatpush3.bf16.msra.mxu1 %v2473_v22  ;;  %v672_v22 = vld [vmem:[#allocation7 + $0x420] sm:$0xff]  ;;  %v2505_v30 = vpack.c.bf16 %v682_v27, %v679_v26 }
  0x9f   :  { %520 = vmatmul.mubr.f32.vlgmr.msra.gmra.mrb[4].mxu0 %v3080_v49  ;;  %2510 = vmatprep.subr.bf16.mxu1 %v2509_v32  ;;  %v2503_v25 = vpack.c.bf16 %v675_v23, %v672_v22 }
  0xa0   :  { %525 = vmatprep.mubr.f32.mxu0 %v2977_v0  ;;  %2480 = vmatpush1.bf16.msra.mxu0 %v2479_v33  ;;  %v2537_v33 = vpack.c.bf16 %v683_v31, %v680_v28 }
  0xa1   :  { %2102 = vmatmul.mubr.f32.vlgmr.msra.gmra.mrb[2].mxu1 %v3083_v29  ;;  %2482 = vmatprep.subr.bf16.mxu0 %v2481_v37  ;;  %v96_v37 = vlaneseq }
  0xa2   :  { %2512 = vmatpush3.bf16.msra.mxu1 %v2509_v32  ;;  %v678_v32 = vld [vmem:[#allocation7 + $0x450] sm:$0xff] }
  0xa3   :  { %526 = vmatmul.mubr.f32.gmra.mrb[6].mxu0 %v3083_v29  ;;  %2514 = vmatprep.subr.bf16.mxu1 %v2513_v41  ;;  %v2507_v35 = vpack.c.bf16 %v681_v34, %v678_v32  ;;  %v3098_v38 = vshrl.u32 %v96_v37, 7 }
  0xa4   :  { %748 = vmatprep.mubr.f32.mxu0 %v2977_v0  ;;  %2484 = vmatpush1.bf16.msra.mxu0 %v2483_v42 }
  0xa5   :  { %2486 = vmatprep.subr.bf16.mxu0 %v2485_v46  ;;  %v98_v39 = vadd.s32 8, %v3098_v38  ;;  %vm345_vm0 = vcmp.lt.s32.totalorder %v3098_v38, 7  ;;  %vm334_vm2 = vcmp.lt.s32.totalorder %v3098_v38, 1 }
  0xa6   :  { %2516 = vmatpush3.bf16.msra.mxu1 %v2513_v41  ;;  %v3105_v41 = vand.u32 7, %v3098_v38 }
  0xa7   :  { %2518 = vmatprep.subr.bf16.mxu1 %v2517_v51  ;;  %v3107_v42 = vand.u32 7, %v98_v39 }
  0xa8   :  { %2488 = vmatpush1.bf16.msra.mxu0 %v2487_v52  ;;  %vm123_vm1 = vcmp.eq.s32.totalorder %v3105_v41, 0  ;;  %vm3114_vm4 = vcmp.eq.s32.totalorder %v3105_v41, %v126_v45  ;;  %vm3143_vm6 = vcmp.lt.s32.totalorder %v3105_v41, %v129_v5 }
  0xa9   :  { %2490 = vmatprep.subr.bf16.mxu0 %v2489_v56  ;;  %vm124_vm3 = vcmp.eq.s32.totalorder %v3107_v42, 0  ;;  %vm3119_vm5 = vcmp.eq.s32.totalorder %v3107_v42, %v126_v45  ;;  %vm3148_vm7 = vcmp.lt.s32.totalorder %v3107_v42, %v129_v5 }
  0xaa   :  { %2520 = vmatpush3.bf16.msra.mxu1 %v2517_v51 }
  0xab   :  { %2522 = vmatprep.subr.bf16.mxu1 %v2521_v60 }
  0xac   :  { %2492 = vmatpush1.bf16.msra.mxu0 %v2491_v61 }
  0xad   :  { %2494 = vmatprep.subr.bf16.mxu0 %v2493_v2 }
  0xae   :  { %2524 = vmatpush3.bf16.msra.mxu1 %v2521_v60 }
  0xaf   :  { %2526 = vmatprep.subr.bf16.mxu1 %v2525_v6 }
  0xb0   :  { %2496 = vmatpush1.bf16.msra.mxu0 %v2495_v7 }
  0xb1   :  { %2498 = vmatprep.subr.bf16.mxu0 %v2497_v11 }
  0xb2   :  { %2528 = vmatpush3.bf16.msra.mxu1 %v2525_v6 }
  0xb3   :  { %2530 = vmatprep.subr.bf16.mxu1 %v2529_v15 }
  0xb4   :  { %2500 = vmatpush1.bf16.msra.mxu0 %v2499_v16 }
  0xb5   :  { %2502 = vmatprep.subr.bf16.mxu0 %v2501_v20 }
  0xb6   :  { %2532 = vmatpush3.bf16.msra.mxu1 %v2529_v15 }
  0xb7   :  { %2534 = vmatprep.subr.bf16.mxu1 %v2533_v24 }
  0xb8   :  { %2504 = vmatpush1.bf16.msra.mxu0 %v2503_v25  ;;  %v3156_v25 = vstv %s2806_s0 }
  0xb9   :  { %2506 = vmatprep.subr.bf16.mxu0 %v2505_v30 }
  0xba   :  { %2536 = vmatpush3.bf16.msra.mxu1 %v2533_v24 }
  0xbb   :  { %2538 = vmatprep.subr.bf16.mxu1 %v2537_v33 }
  0xbc   :  { %2508 = vmatpush1.bf16.msra.mxu0 %v2507_v35 }
  0xbd   :  { %2541 = vmatprep.subr.bf16.mxu0 %v2978_v36 }
  0xbe   :  { %2540 = vmatpush3.bf16.msra.mxu1 %v2537_v33 }
  0xbf   :  { %2565 = vmatprep.subr.bf16.mxu1 %v2978_v36 }
 0x152   :  { %v246_v40 = vpop.f32.mrb[0].mxu0 }
 0x153   :  { %v248_v43 = vpop.f32.mrb[1].mxu0  ;;  %v332_v51 = vrot.slane %v246_v40, 7 }
 0x154   :  { %v2068_v44 = vpop.f32.mrb[0].mxu1 }
 0x155   :  { %v344_v46 = vrot.slane %v2068_v44, 1  ;;  %v323_v47 = vpop.f32.mrb[1].mxu1 }
 0x156   :  { %v252_v48 = vpop.f32.mrb[2].mxu0  ;;  %v343_v50 = vrot.slane %v323_v47, 1 }
 0x157   :  { %v333_v52 = vrot.slane %v252_v48, 7  ;;  %v254_v55 = vpop.f32.mrb[3].mxu0 }
 0x158   :  { %v346_v56 = vsel %vm345_vm0, %v343_v50, %v344_v46  ;;  %v347_v57 = vsel %vm345_vm0, %v344_v46, %v343_v50 }
 0x159   :  { %v336_v58 = vsel %vm334_vm2, %v333_v52, %v332_v51  ;;  %v335_v59 = vsel %vm334_vm2, %v332_v51, %v333_v52  ;;  %v352_v61 = vsel %vm3114_vm4, 0.0, %v346_v56  ;;  %v353_v63 = vsel %vm3119_vm5, 0.0, %v347_v57 }
 0x15a   :  { %v341_v60 = vsel %vm123_vm1, 0.0, %v336_v58  ;;  %v342_v62 = vsel %vm124_vm3, 0.0, %v335_v59  ;;  %v1869_v59 = vld [vmem:[#allocation9 + $0x1] ss:$0 sm:$0xff] }
 0x15b   :  { %v354_v1 = vadd.f32 %v341_v60, %v248_v43  ;;  %v355_v2 = vadd.f32 %v342_v62, %v254_v55  ;;  %v390_v62 = vld [vmem:[#allocation10] sm:$0xff] }
 0x15d   :  { %v356_v4 = vadd.f32 %v354_v1, %v352_v61  ;;  %v357_v6 = vadd.f32 %v355_v2, %v353_v63  ;;  %v391_v63 = vld [vmem:[#allocation10 + $0x8] sm:$0xff] }
 0x15e   :  { %v2566_v5 = vpack.c.bf16 %v391_v63, %v390_v62  ;;  %v1051_v62 = vld [vmem:[#allocation7 + $0x4a0] sm:$0xff] }
 0x15f   :  { %v365_v7 = vadd.f32 %v1868_v3, %v356_v4  ;;  %v366_v8 = vadd.f32 %v1868_v3, %v357_v6  ;;  %v392_v6 = vld [vmem:[#allocation10 + $0x10] sm:$0xff] }
 0x161   :  { %v367_v11 = vmax.f32 %v365_v7, 0.0  ;;  %v368_v12 = vmax.f32 %v366_v8, 0.0  ;;  %v393_v7 = vld [vmem:[#allocation10 + $0x18] sm:$0xff] }
 0x162   :  { %v2569_v8 = vpack.c.bf16 %v393_v7, %v392_v6  ;;  %v1061_v7 = vld [vmem:[#allocation7 + $0x4f0] sm:$0xff] }
 0x163   :  { %v373_v13 = vsel %vm3143_vm6, %v367_v11, 0.0  ;;  %v374_v14 = vsel %vm3148_vm7, %v368_v12, 0.0  ;;  %v394_v11 = vld [vmem:[#allocation10 + $0x20] sm:$0xff]  ;;  %v395_v12 = vld [vmem:[#allocation10 + $0x28] sm:$0xff] }
 0x164   :  { %v375_v15 = vrot.slane %v373_v13, 4  ;;  %v381_v16 = vrot.slane %v374_v14, 4 }
 0x166   :  { %v376_v17 = vadd.f32 %v375_v15, %v373_v13  ;;  %v382_v18 = vadd.f32 %v381_v16, %v374_v14  ;;  %v2572_v13 = vpack.c.bf16 %v395_v12, %v394_v11  ;;  %v396_v14 = vld [vmem:[#allocation10 + $0x30] sm:$0xff]  ;;  %v397_v15 = vld [vmem:[#allocation10 + $0x38] sm:$0xff] }
 0x167   :  { %v2575_v16 = vpack.c.bf16 %v397_v15, %v396_v14  ;;  %v1067_v12 = vld [vmem:[#allocation7 + $0x520] sm:$0xff]  ;;  %v1073_v15 = vld [vmem:[#allocation7 + $0x550] sm:$0xff] }
 0x168   :  { %v377_v19 = vrot.slane %v376_v17, 2  ;;  %v383_v20 = vrot.slane %v382_v18, 2 }
 0x16a   :  { %v384_v21 = vadd.f32 %v383_v20, %v382_v18  ;;  %v378_v22 = vadd.f32 %v377_v19, %v376_v17  ;;  %v398_v17 = vld [vmem:[#allocation10 + $0x40] sm:$0xff]  ;;  %v399_v18 = vld [vmem:[#allocation10 + $0x48] sm:$0xff]  ;;  %v400_v20 = vld [vmem:[#allocation10 + $0x50] sm:$0xff] }
 0x16b   :  { %v2578_v19 = vpack.c.bf16 %v399_v18, %v398_v17  ;;  %v1079_v18 = vld [vmem:[#allocation7 + $0x580] sm:$0xff] }
 0x16c   :  { %v379_v23 = vrot.slane %v378_v22, 1  ;;  %v385_v24 = vrot.slane %v384_v21, 1 }
 0x16e   :  { %v380_v26 = vadd.f32 %v379_v23, %v378_v22  ;;  %v386_v27 = vadd.f32 %v385_v24, %v384_v21  ;;  %v401_v21 = vld [vmem:[#allocation10 + $0x58] sm:$0xff]  ;;  %v402_v23 = vld [vmem:[#allocation10 + $0x60] sm:$0xff]  ;;  %v403_v24 = vld [vmem:[#allocation10 + $0x68] sm:$0xff] }
 0x16f   :  { %v2581_v22 = vpack.c.bf16 %v401_v21, %v400_v20  ;;  %v1085_v21 = vld [vmem:[#allocation7 + $0x5b0] sm:$0xff] }
 0x170   :  { %v388_v28 = vmul.f32 %v3156_v25, %v380_v26  ;;  %v389_v30 = vmul.f32 %v3156_v25, %v386_v27  ;;  %v2584_v26 = vpack.c.bf16 %v403_v24, %v402_v23  ;;  %v404_v27 = vld [vmem:[#allocation10 + $0x70] sm:$0xff]  ;;  %v1091_v24 = vld [vmem:[#allocation7 + $0x5e0] sm:$0xff] }
 0x172   :  { %v521_v31 = vpop.f32.mrb[4].mxu0  ;;  %v3161_v32 = vsel %vm899_vm8, %v389_v30, %v388_v28  ;;  %v405_v28 = vld [vmem:[#allocation10 + $0x78] sm:$0xff] }
 0x173   :  { %v523_v33 = vpop.f32.mrb[5].mxu0  ;;  %v607_v43 = vrot.slane %v521_v31, 7  ;;  %v2587_v30 = vpack.c.bf16 %v405_v28, %v404_v27  ;;  %v881_v31 = vld [vmem:[#allocation10 + $0x80] sm:$0xff] }
 0x174   :  { %v2103_v34 = vpop.f32.mrb[2].mxu1 }
 0x175   :  { %v614_v35 = vrot.slane %v2103_v34, 1  ;;  %v598_v37 = vpop.f32.mrb[3].mxu1 }
 0x176   :  { %v527_v39 = vpop.f32.mrb[6].mxu0  ;;  %v613_v40 = vrot.slane %v598_v37, 1  ;;  %v884_v37 = vld [vmem:[#allocation10 + $0x98] sm:$0xff] }
 0x177   :  { %v608_v44 = vrot.slane %v527_v39, 7  ;;  %v529_v45 = vpop.f32.mrb[7].mxu0 }
 0x178   :  { %v615_v46 = vsel %vm345_vm0, %v613_v40, %v614_v35  ;;  %v616_v47 = vsel %vm345_vm0, %v614_v35, %v613_v40  ;;  %v883_v35 = vld [vmem:[#allocation10 + $0x90] sm:$0xff]  ;;  %v885_v40 = vld [vmem:[#allocation10 + $0xa0] sm:$0xff] }
 0x179   :  { %v610_v48 = vsel %vm334_vm2, %v608_v44, %v607_v43  ;;  %v609_v50 = vsel %vm334_vm2, %v607_v43, %v608_v44  ;;  %v617_v55 = vsel %vm3114_vm4, 0.0, %v615_v46  ;;  %v618_v56 = vsel %vm3119_vm5, 0.0, %v616_v47  ;;  %v886_v43 = vld [vmem:[#allocation10 + $0xa8] sm:$0xff]  ;;  %v889_v46 = vld [vmem:[#allocation10 + $0xc0] sm:$0xff] }
 0x17a   :  { %v611_v51 = vsel %vm123_vm1, 0.0, %v610_v48  ;;  %v612_v52 = vsel %vm124_vm3, 0.0, %v609_v50  ;;  %v2545_v39 = vpack.c.bf16 %v884_v37, %v883_v35  ;;  %v2548_v44 = vpack.c.bf16 %v886_v43, %v885_v40  ;;  %v890_v47 = vld [vmem:[#allocation10 + $0xc8] sm:$0xff]  ;;  %v891_v50 = vld [vmem:[#allocation10 + $0xd0] sm:$0xff] }
 0x17b   :  { %v619_v57 = vadd.f32 %v611_v51, %v523_v33  ;;  %v620_v58 = vadd.f32 %v612_v52, %v529_v45  ;;  %v882_v33 = vld [vmem:[#allocation10 + $0x88] sm:$0xff]  ;;  %v2554_v48 = vpack.c.bf16 %v890_v47, %v889_v46  ;;  %v892_v51 = vld [vmem:[#allocation10 + $0xd8] sm:$0xff] }
 0x17c   :  { %v2542_v34 = vpack.c.bf16 %v882_v33, %v881_v31  ;;  %v2557_v52 = vpack.c.bf16 %v892_v51, %v891_v50 }
 0x17d   :  { %v621_v60 = vadd.f32 %v619_v57, %v617_v55  ;;  %v622_v61 = vadd.f32 %v620_v58, %v618_v56  ;;  %v893_v55 = vld [vmem:[#allocation10 + $0xe0] sm:$0xff]  ;;  %v894_v56 = vld [vmem:[#allocation10 + $0xe8] sm:$0xff]  ;;  %v895_v58 = vld [vmem:[#allocation10 + $0xf0] sm:$0xff] }
 0x17e   :  { %v2560_v57 = vpack.c.bf16 %v894_v56, %v893_v55 }
 0x17f   :  { %v631_v1 = vadd.f32 %v1869_v59, %v621_v60  ;;  %v632_v2 = vadd.f32 %v1869_v59, %v622_v61  ;;  %v896_v59 = vld [vmem:[#allocation10 + $0xf8] sm:$0xff]  ;;  %v1048_v61 = vld [vmem:[#allocation7 + $0x488] sm:$0xff] }
 0x180   :  { %v2563_v60 = vpack.c.bf16 %v896_v59, %v895_v58  ;;  %v2589_v63 = vpack.c.bf16 %v1051_v62, %v1048_v61 }
 0x181   :  { %v633_v3 = vmax.f32 %v631_v1, 0.0  ;;  %v634_v4 = vmax.f32 %v632_v2, 0.0  ;;  %v1049_v1 = vld [vmem:[#allocation7 + $0x490] sm:$0xff]  ;;  %v1052_v2 = vld [vmem:[#allocation7 + $0x4a8] sm:$0xff] }
 0x183   :  { %749 = vmatmul.mubr.f32.vlgmr.msra.gmra.mrb[8].mxu0 %v633_v3  ;;  %2136 = vmatprep.mubr.f32.mxu1 %v633_v3  ;;  %v2621_v3 = vpack.c.bf16 %v1052_v2, %v1049_v1 }
 0x184   :  { %2137 = vmatmul.mubr.f32.vlgmr.msra.gmra.mrb[4].mxu1 %v634_v4  ;;  %754 = vmatprep.mubr.f32.mxu0 %v2977_v0 }
 0x185   :  { %2567 = vmatpush3.bf16.msra.mxu1 %v2566_v5  ;;  %2206 = vmatprep.mubr.msk.f32.mxu1 %vm2979_vm9, %v2977_v0  ;;  %v1058_v5 = vld [vmem:[#allocation7 + $0x4d8] sm:$0xff] }
 0x186   :  { %2568 = vmatprep.subr.bf16.mxu1 %v2978_v36  ;;  %2543 = vmatpush3.bf16.msra.mxu0 %v2542_v34 }
 0x187   :  { %755 = vmatmul.mubr.f32.gmra.mrb[10].mxu0 %v634_v4  ;;  %2544 = vmatprep.subr.bf16.mxu0 %v2978_v36  ;;  %v1055_v4 = vld [vmem:[#allocation7 + $0x4c0] sm:$0xff] }
 0x188   :  { %2171 = vmatprep.mubr.msk.f32.mxu0 %vm2979_vm9, %v2977_v0  ;;  %v2625_v6 = vpack.c.bf16 %v1058_v5, %v1055_v4 }
 0x189   :  { %2570 = vmatpush3.bf16.msra.mxu1 %v2569_v8  ;;  %v1064_v8 = vld [vmem:[#allocation7 + $0x508] sm:$0xff] }
 0x18a   :  { %2571 = vmatprep.subr.bf16.mxu1 %v2978_v36  ;;  %2546 = vmatpush3.bf16.msra.mxu0 %v2545_v39  ;;  %v2629_v11 = vpack.c.bf16 %v1064_v8, %v1061_v7 }
 0x18b   :  { %2547 = vmatprep.subr.bf16.mxu0 %v2978_v36 }
 0x18d   :  { %2573 = vmatpush3.bf16.msra.mxu1 %v2572_v13  ;;  %v1070_v13 = vld [vmem:[#allocation7 + $0x538] sm:$0xff] }
 0x18e   :  { %2574 = vmatprep.subr.bf16.mxu1 %v2978_v36  ;;  %2549 = vmatpush3.bf16.msra.mxu0 %v2548_v44  ;;  %v2633_v14 = vpack.c.bf16 %v1070_v13, %v1067_v12  ;;  %v1047_v12 = vld [vmem:[#allocation7 + $0x480] sm:$0xff]  ;;  %v1050_v13 = vld [vmem:[#allocation7 + $0x498] sm:$0xff] }
 0x18f   :  { %2550 = vmatprep.subr.bf16.mxu0 %v2978_v36 }
 0x191   :  { %2576 = vmatpush3.bf16.msra.mxu1 %v2575_v16  ;;  %v1076_v16 = vld [vmem:[#allocation7 + $0x568] sm:$0xff] }
 0x192   :  { %2577 = vmatprep.subr.bf16.mxu1 %v2978_v36  ;;  %v2637_v17 = vpack.c.bf16 %v1076_v16, %v1073_v15  ;;  %v1054_v16 = vld [vmem:[#allocation7 + $0x4b8] sm:$0xff] }
 0x195   :  { %2579 = vmatpush3.bf16.msra.mxu1 %v2578_v19  ;;  %v1082_v19 = vld [vmem:[#allocation7 + $0x598] sm:$0xff] }
 0x196   :  { %2580 = vmatprep.subr.bf16.mxu1 %v2978_v36  ;;  %v2641_v20 = vpack.c.bf16 %v1082_v19, %v1079_v18 }
 0x199   :  { %2582 = vmatpush3.bf16.msra.mxu1 %v2581_v22  ;;  %v1088_v22 = vld [vmem:[#allocation7 + $0x5c8] sm:$0xff] }
 0x19a   :  { %2583 = vmatprep.subr.bf16.mxu1 %v2978_v36  ;;  %v2645_v23 = vpack.c.bf16 %v1088_v22, %v1085_v21  ;;  %v1053_v22 = vld [vmem:[#allocation7 + $0x4b0] sm:$0xff] }
 0x19d   :  { %2585 = vmatpush3.bf16.msra.mxu1 %v2584_v26  ;;  %v1094_v26 = vld [vmem:[#allocation7 + $0x5f8] sm:$0xff] }
 0x19e   :  { %2586 = vmatprep.subr.bf16.mxu1 %v2978_v36  ;;  %v2649_v27 = vpack.c.bf16 %v1094_v26, %v1091_v24  ;;  %v1060_v26 = vld [vmem:[#allocation7 + $0x4e8] sm:$0xff] }
 0x1a1   :  { %2588 = vmatpush3.bf16.msra.mxu1 %v2587_v30 }
 0x1a2   :  { %2622 = vmatprep.subr.bf16.mxu1 %v2621_v3 }
 0x1a4   :  { %2207 = vmatmul.mubr.f32.vlgmr.msra.gmra.mrb[6].mxu1 %v3161_v32  ;;  %v887_v32 = vld [vmem:[#allocation10 + $0xb0] sm:$0xff] }
 0x1a5   :  { %2241 = vmatprep.mubr.f32.mxu1 %v3080_v49  ;;  %v888_v49 = vld [vmem:[#allocation10 + $0xb8] sm:$0xff]  ;;  %2624 = vmatpush3.bf16.msra.mxu1 %v2621_v3 }
 0x1a6   :  { %v2551_v45 = vpack.c.bf16 %v888_v49, %v887_v32  ;;  %2626 = vmatprep.subr.bf16.mxu1 %v2625_v6 }
 0x1a8   :  { %2552 = vmatpush3.bf16.msra.mxu0 %v2551_v45 }
 0x1a9   :  { %2553 = vmatprep.subr.bf16.mxu0 %v2978_v36  ;;  %2628 = vmatpush3.bf16.msra.mxu1 %v2625_v6 }
 0x1aa   :  { %2630 = vmatprep.subr.bf16.mxu1 %v2629_v11 }
 0x1ac   :  { %2555 = vmatpush3.bf16.msra.mxu0 %v2554_v48 }
 0x1ad   :  { %2556 = vmatprep.subr.bf16.mxu0 %v2978_v36  ;;  %2632 = vmatpush3.bf16.msra.mxu1 %v2629_v11 }
 0x1ae   :  { %2634 = vmatprep.subr.bf16.mxu1 %v2633_v14 }
 0x1b0   :  { %2558 = vmatpush3.bf16.msra.mxu0 %v2557_v52  ;;  %v1870_v52 = vld [vmem:[#allocation9 + $0x2] ss:$0 sm:$0xff] }
 0x1b1   :  { %2559 = vmatprep.subr.bf16.mxu0 %v2978_v36  ;;  %2636 = vmatpush3.bf16.msra.mxu1 %v2633_v14 }
 0x1b2   :  { %2638 = vmatprep.subr.bf16.mxu1 %v2637_v17 }
 0x1b4   :  { %2561 = vmatpush3.bf16.msra.mxu0 %v2560_v57 }
 0x1b5   :  { %2562 = vmatprep.subr.bf16.mxu0 %v2978_v36  ;;  %2640 = vmatpush3.bf16.msra.mxu1 %v2637_v17  ;;  %v1057_v17 = vld [vmem:[#allocation7 + $0x4d0] sm:$0xff] }
 0x1b6   :  { %2642 = vmatprep.subr.bf16.mxu1 %v2641_v20  ;;  %v2593_v21 = vpack.c.bf16 %v1057_v17, %v1054_v16  ;;  %v1279_v16 = vld [vmem:[#allocation7 + $0x618] sm:$0xff]  ;;  %v1278_v17 = vld [vmem:[#allocation7 + $0x610] sm:$0xff] }
 0x1b8   :  { %2564 = vmatpush3.bf16.msra.mxu0 %v2563_v60 }
 0x1b9   :  { %2590 = vmatprep.subr.bf16.mxu0 %v2589_v63  ;;  %2644 = vmatpush3.bf16.msra.mxu1 %v2641_v20  ;;  %v2591_v20 = vpack.c.bf16 %v1050_v13, %v1047_v12  ;;  %v1277_v12 = vld [vmem:[#allocation7 + $0x608] sm:$0xff]  ;;  %v1280_v13 = vld [vmem:[#allocation7 + $0x620] sm:$0xff] }
 0x1ba   :  { %2646 = vmatprep.subr.bf16.mxu1 %v2645_v23 }
 0x1bd   :  { %2648 = vmatpush3.bf16.msra.mxu1 %v2645_v23  ;;  %v1056_v23 = vld [vmem:[#allocation7 + $0x4c8] sm:$0xff] }
 0x1be   :  { %2650 = vmatprep.subr.bf16.mxu1 %v2649_v27 }
 0x1c1   :  { %2652 = vmatpush3.bf16.msra.mxu1 %v2649_v27  ;;  %v1063_v27 = vld [vmem:[#allocation7 + $0x500] sm:$0xff] }
 0x1c4   :  { %2242 = vmatmul.mubr.f32.vlgmr.msra.gmra.mrb[8].mxu1 %v3083_v29 }
 0x256   :  { %v750_v28 = vpop.f32.mrb[8].mxu0 }
 0x257   :  { %v752_v30 = vpop.f32.mrb[9].mxu0  ;;  %v2138_v31 = vpop.f32.mrb[4].mxu1  ;;  %v836_v39 = vrot.slane %v750_v28, 7 }
 0x258   :  { %v843_v33 = vrot.slane %v2138_v31, 1  ;;  %v827_v34 = vpop.f32.mrb[5].mxu1  ;;  %v2595_v31 = vpack.c.bf16 %v1056_v23, %v1053_v22  ;;  %v1286_v22 = vld [vmem:[#allocation7 + $0x650] sm:$0xff] }
 0x259   :  { %v842_v35 = vrot.slane %v827_v34, 1  ;;  %v1059_v34 = vld [vmem:[#allocation7 + $0x4e0] sm:$0xff]  ;;  %v1282_v23 = vld [vmem:[#allocation7 + $0x630] sm:$0xff] }
 0x25a   :  { %v756_v37 = vpop.f32.mrb[10].mxu0 }
 0x25b   :  { %v844_v40 = vsel %vm345_vm0, %v842_v35, %v843_v33  ;;  %v837_v43 = vrot.slane %v756_v37, 7  ;;  %v758_v44 = vpop.f32.mrb[11].mxu0  ;;  %v845_v32 = vsel %vm345_vm0, %v843_v33, %v842_v35  ;;  %v2597_v33 = vpack.c.bf16 %v1063_v27, %v1060_v26  ;;  %v1062_v35 = vld [vmem:[#allocation7 + $0x4f8] sm:$0xff]  ;;  %v1285_v26 = vld [vmem:[#allocation7 + $0x648] sm:$0xff]  ;;  %v1284_v27 = vld [vmem:[#allocation7 + $0x640] sm:$0xff] }
 0x25c   :  { %v846_v50 = vsel %vm3114_vm4, 0.0, %v844_v40  ;;  %v847_v51 = vsel %vm3119_vm5, 0.0, %v845_v32  ;;  %v1066_v37 = vld [vmem:[#allocation7 + $0x518] sm:$0xff]  ;;  %v2599_v40 = vpack.c.bf16 %v1062_v35, %v1059_v34  ;;  %v1068_v32 = vld [vmem:[#allocation7 + $0x528] sm:$0xff]  ;;  %v1292_v35 = vld [vmem:[#allocation7 + $0x680] sm:$0xff] }
 0x25d   :  { %v839_v49 = vsel %vm334_vm2, %v837_v43, %v836_v39  ;;  %v838_v29 = vsel %vm334_vm2, %v836_v39, %v837_v43  ;;  %v1069_v39 = vld [vmem:[#allocation7 + $0x530] sm:$0xff]  ;;  %v1289_v34 = vld [vmem:[#allocation7 + $0x668] sm:$0xff] }
 0x25e   :  { %v840_v45 = vsel %vm123_vm1, 0.0, %v839_v49  ;;  %v841_v46 = vsel %vm124_vm3, 0.0, %v838_v29  ;;  %v2601_v43 = vpack.c.bf16 %v1069_v39, %v1066_v37  ;;  %v1072_v49 = vld [vmem:[#allocation7 + $0x548] sm:$0xff]  ;;  %v1075_v29 = vld [vmem:[#allocation7 + $0x560] sm:$0xff]  ;;  %v2661_v39 = vpack.c.bf16 %v1292_v35, %v1289_v34  ;;  %v1318_v35 = vld [vmem:[#allocation7 + $0x750] sm:$0xff] }
 0x25f   :  { %v848_v47 = vadd.f32 %v840_v45, %v752_v30  ;;  %v849_v48 = vadd.f32 %v841_v46, %v758_v44  ;;  %v1065_v44 = vld [vmem:[#allocation7 + $0x510] sm:$0xff]  ;;  %v2605_v46 = vpack.c.bf16 %v1075_v29, %v1072_v49  ;;  %v1288_v37 = vld [vmem:[#allocation7 + $0x660] sm:$0xff]  ;;  %v1295_v49 = vld [vmem:[#allocation7 + $0x698] sm:$0xff] }
 0x260   :  { %v2603_v45 = vpack.c.bf16 %v1068_v32, %v1065_v44  ;;  %v1293_v44 = vld [vmem:[#allocation7 + $0x688] sm:$0xff]  ;;  %v1298_v29 = vld [vmem:[#allocation7 + $0x6b0] sm:$0xff] }
 0x261   :  { %v850_v55 = vadd.f32 %v848_v47, %v846_v50  ;;  %v851_v56 = vadd.f32 %v849_v48, %v847_v51  ;;  %v1071_v47 = vld [vmem:[#allocation7 + $0x540] sm:$0xff]  ;;  %v1074_v48 = vld [vmem:[#allocation7 + $0x558] sm:$0xff]  ;;  %v1081_v51 = vld [vmem:[#allocation7 + $0x590] sm:$0xff] }
 0x262   :  { %v1078_v50 = vld [vmem:[#allocation7 + $0x578] sm:$0xff] }
 0x263   :  { %v860_v57 = vadd.f32 %v1870_v52, %v850_v55  ;;  %v861_v58 = vadd.f32 %v1870_v52, %v851_v56  ;;  %v2607_v52 = vpack.c.bf16 %v1074_v48, %v1071_v47  ;;  %v2609_v55 = vpack.c.bf16 %v1081_v51, %v1078_v50  ;;  %v1077_v56 = vld [vmem:[#allocation7 + $0x570] sm:$0xff]  ;;  %v1297_v51 = vld [vmem:[#allocation7 + $0x6a8] sm:$0xff] }
 0x264   :  { %v2665_v48 = vpack.c.bf16 %v1298_v29, %v1295_v49  ;;  %v1294_v50 = vld [vmem:[#allocation7 + $0x690] sm:$0xff]  ;;  %v1509_v49 = vld [vmem:[#allocation7 + $0x7a0] sm:$0xff] }
 0x265   :  { %v862_v59 = vmax.f32 %v860_v57, 0.0  ;;  %v863_v60 = vmax.f32 %v861_v58, 0.0  ;;  %v1080_v57 = vld [vmem:[#allocation7 + $0x588] sm:$0xff] }
 0x266   :  { %v1084_v58 = vld [vmem:[#allocation7 + $0x5a8] sm:$0xff] }
 0x267   :  { %v864_v61 = vsel %vm3143_vm6, %v862_v59, 0.0  ;;  %v865_v62 = vsel %vm3148_vm7, %v863_v60, 0.0  ;;  %v1087_v59 = vld [vmem:[#allocation7 + $0x5c0] sm:$0xff]  ;;  %v2611_v60 = vpack.c.bf16 %v1080_v57, %v1077_v56  ;;  %v1301_v56 = vld [vmem:[#allocation7 + $0x6c8] sm:$0xff] }
 0x268   :  { %v866_v63 = vrot.slane %v864_v61, 4  ;;  %v872_v1 = vrot.slane %v865_v62, 4  ;;  %v1304_v57 = vld [vmem:[#allocation7 + $0x6e0] sm:$0xff] }
 0x26a   :  { %v867_v2 = vadd.f32 %v866_v63, %v864_v61  ;;  %v873_v3 = vadd.f32 %v872_v1, %v865_v62  ;;  %v2613_v61 = vpack.c.bf16 %v1087_v59, %v1084_v58  ;;  %v1083_v62 = vld [vmem:[#allocation7 + $0x5a0] sm:$0xff]  ;;  %v1086_v63 = vld [vmem:[#allocation7 + $0x5b8] sm:$0xff]  ;;  %v2669_v58 = vpack.c.bf16 %v1304_v57, %v1301_v56 }
 0x26b   :  { %v1090_v1 = vld [vmem:[#allocation7 + $0x5d8] sm:$0xff]  ;;  %v1300_v59 = vld [vmem:[#allocation7 + $0x6c0] sm:$0xff] }
 0x26c   :  { %v868_v4 = vrot.slane %v867_v2, 2  ;;  %v874_v5 = vrot.slane %v873_v3, 2 }
 0x26e   :  { %v869_v6 = vadd.f32 %v868_v4, %v867_v2  ;;  %v875_v7 = vadd.f32 %v874_v5, %v873_v3  ;;  %v1093_v2 = vld [vmem:[#allocation7 + $0x5f0] sm:$0xff]  ;;  %v2615_v3 = vpack.c.bf16 %v1086_v63, %v1083_v62  ;;  %v1305_v63 = vld [vmem:[#allocation7 + $0x6e8] sm:$0xff] }
 0x26f   :  { %v2617_v4 = vpack.c.bf16 %v1093_v2, %v1090_v1  ;;  %v1089_v5 = vld [vmem:[#allocation7 + $0x5d0] sm:$0xff]  ;;  %v1307_v2 = vld [vmem:[#allocation7 + $0x6f8] sm:$0xff] }
 0x270   :  { %v870_v8 = vrot.slane %v869_v6, 1  ;;  %v876_v11 = vrot.slane %v875_v7, 1 }
 0x272   :  { %v877_v14 = vadd.f32 %v876_v11, %v875_v7  ;;  %v871_v15 = vadd.f32 %v870_v8, %v869_v6  ;;  %v1092_v6 = vld [vmem:[#allocation7 + $0x5e8] sm:$0xff]  ;;  %v2824_v8 = vld [vmem:[#allocation4] sm:$0xff]  ;;  %v2825_v11 = vld [vmem:[#allocation4 + $0x8] sm:$0xff] }
 0x273   :  { %v2619_v7 = vpack.c.bf16 %v1092_v6, %v1089_v5  ;;  %v1306_v5 = vld [vmem:[#allocation7 + $0x6f0] sm:$0xff]  ;;  %v1309_v6 = vld [vmem:[#allocation7 + $0x708] sm:$0xff] }
 0x274   :  { %v878_v18 = vmul.f32 %v871_v15, %v3156_v25  ;;  %v879_v19 = vmul.f32 %v877_v14, %v3156_v25  ;;  %v1276_v14 = vld [vmem:[#allocation7 + $0x600] sm:$0xff]  ;;  %v2653_v15 = vpack.c.bf16 %v1280_v13, %v1277_v12 }
 0x276   :  { %v900_v24 = vsel %vm899_vm8, %v879_v19, %v878_v18  ;;  %v1281_v18 = vld [vmem:[#allocation7 + $0x628] sm:$0xff]  ;;  %v2655_v19 = vpack.c.bf16 %v1279_v16, %v1276_v14 }
 0x277   :  { %v3224_v28 = vpop.f32.mrb[6].mxu1  ;;  %2172 = vmatmul.mubr.f32.vlgmr.msra.gmra.mrb[12].mxu0 %v900_v24  ;;  %v1313_v16 = vld [vmem:[#allocation7 + $0x728] sm:$0xff] }
 0x278   :  { %v2208_v30 = vpop.f32.mrb[7].mxu1  ;;  %2592 = vmatpush1.bf16.msra.mxu0 %v2591_v20  ;;  %1159 = vmatprep.mubr.f32.mxu0 %v2977_v0  ;;  %v2685_v20 = vpack.c.bf16 %v1281_v18, %v1278_v17  ;;  %v1316_v17 = vld [vmem:[#allocation7 + $0x740] sm:$0xff] }
 0x279   :  { %2594 = vmatprep.subr.bf16.mxu0 %v2593_v21  ;;  %v1283_v21 = vld [vmem:[#allocation7 + $0x638] sm:$0xff] }
 0x27a   :  { %v2657_v24 = vpack.c.bf16 %v1286_v22, %v1283_v21  ;;  %v1287_v30 = vld [vmem:[#allocation7 + $0x658] sm:$0xff]  ;;  %2686 = vmatprep.subr.bf16.mxu1 %v2685_v20  ;;  %v1314_v22 = vld [vmem:[#allocation7 + $0x730] sm:$0xff] }
 0x27b   :  { %2688 = vmatpush3.bf16.msra.mxu1 %v2685_v20  ;;  %v1312_v20 = vld [vmem:[#allocation7 + $0x720] sm:$0xff]  ;;  %v1315_v21 = vld [vmem:[#allocation7 + $0x738] sm:$0xff] }
 0x27c   :  { %2596 = vmatpush1.bf16.msra.mxu0 %v2595_v31  ;;  %v2659_v31 = vpack.c.bf16 %v1285_v26, %v1282_v23  ;;  %v2679_v23 = vpack.c.bf16 %v1315_v21, %v1312_v20  ;;  %v1511_v21 = vld [vmem:[#allocation7 + $0x7b0] sm:$0xff] }
 0x27d   :  { %2598 = vmatprep.subr.bf16.mxu0 %v2597_v33  ;;  %v2689_v33 = vpack.c.bf16 %v1287_v30, %v1284_v27 }
 0x27f   :  { %2690 = vmatprep.subr.bf16.mxu1 %v2689_v33 }
 0x280   :  { %2600 = vmatpush1.bf16.msra.mxu0 %v2599_v40  ;;  %v1291_v40 = vld [vmem:[#allocation7 + $0x678] sm:$0xff]  ;;  %2692 = vmatpush3.bf16.msra.mxu1 %v2689_v33  ;;  %v1322_v33 = vld [vmem:[#allocation7 + $0x770] sm:$0xff] }
 0x281   :  { %2602 = vmatprep.subr.bf16.mxu0 %v2601_v43  ;;  %v1290_v43 = vld [vmem:[#allocation7 + $0x670] sm:$0xff]  ;;  %v2663_v47 = vpack.c.bf16 %v1291_v40, %v1288_v37  ;;  %v1321_v37 = vld [vmem:[#allocation7 + $0x768] sm:$0xff]  ;;  %v1320_v40 = vld [vmem:[#allocation7 + $0x760] sm:$0xff] }
 0x282   :  { %v2693_v32 = vpack.c.bf16 %v1293_v44, %v1290_v43  ;;  %v1323_v43 = vld [vmem:[#allocation7 + $0x778] sm:$0xff] }
 0x283   :  { %v2713_v44 = vpack.c.bf16 %v1323_v43, %v1320_v40  ;;  %v1527_v40 = vld [vmem:[#allocation7 + $0x830] sm:$0xff]  ;;  %v1525_v43 = vld [vmem:[#allocation7 + $0x820] sm:$0xff] }
 0x284   :  { %2604 = vmatpush1.bf16.msra.mxu0 %v2603_v45  ;;  %v1296_v45 = vld [vmem:[#allocation7 + $0x6a0] sm:$0xff]  ;;  %2694 = vmatprep.subr.bf16.mxu1 %v2693_v32 }
 0x285   :  { %2606 = vmatprep.subr.bf16.mxu0 %v2605_v46  ;;  %v1299_v46 = vld [vmem:[#allocation7 + $0x6b8] sm:$0xff]  ;;  %2696 = vmatpush3.bf16.msra.mxu1 %v2693_v32  ;;  %v1506_v32 = vld [vmem:[#allocation7 + $0x788] sm:$0xff] }
 0x286   :  { %v2717_v29 = vpack.c.bf16 %v1509_v49, %v1506_v32 }
 0x288   :  { %2608 = vmatpush1.bf16.msra.mxu0 %v2607_v52  ;;  %v2697_v52 = vpack.c.bf16 %v1299_v46, %v1296_v45  ;;  %v1507_v45 = vld [vmem:[#allocation7 + $0x790] sm:$0xff]  ;;  %v1510_v46 = vld [vmem:[#allocation7 + $0x7a8] sm:$0xff] }
 0x289   :  { %2610 = vmatprep.subr.bf16.mxu0 %v2609_v55  ;;  %v2667_v55 = vpack.c.bf16 %v1297_v51, %v1294_v50 }
 0x28a   :  { %2698 = vmatprep.subr.bf16.mxu1 %v2697_v52 }
 0x28b   :  { %2700 = vmatpush3.bf16.msra.mxu1 %v2697_v52 }
 0x28c   :  { %2612 = vmatpush1.bf16.msra.mxu0 %v2611_v60  ;;  %v1303_v60 = vld [vmem:[#allocation7 + $0x6d8] sm:$0xff] }
 0x28d   :  { %2614 = vmatprep.subr.bf16.mxu0 %v2613_v61  ;;  %v1302_v61 = vld [vmem:[#allocation7 + $0x6d0] sm:$0xff]  ;;  %v2671_v62 = vpack.c.bf16 %v1303_v60, %v1300_v59 }
 0x28e   :  { %v2701_v1 = vpack.c.bf16 %v1305_v63, %v1302_v61 }
 0x290   :  { %2616 = vmatpush1.bf16.msra.mxu0 %v2615_v3  ;;  %v1310_v3 = vld [vmem:[#allocation7 + $0x710] sm:$0xff]  ;;  %2702 = vmatprep.subr.bf16.mxu1 %v2701_v1 }
 0x291   :  { %2618 = vmatprep.subr.bf16.mxu0 %v2617_v4  ;;  %v2673_v4 = vpack.c.bf16 %v1310_v3, %v1307_v2  ;;  %2704 = vmatpush3.bf16.msra.mxu1 %v2701_v1 }
 0x294   :  { %2620 = vmatpush1.bf16.msra.mxu0 %v2619_v7  ;;  %v1308_v7 = vld [vmem:[#allocation7 + $0x700] sm:$0xff] }
 0x295   :  { %2654 = vmatprep.subr.bf16.mxu0 %v2653_v15 }
 0x297   :  { %1160 = vmatmul.mubr.f32.vlgmr.msra.gmra.mrb[14].mxu0 %v2824_v8  ;;  %v2675_v8 = vpack.c.bf16 %v1309_v6, %v1306_v5  ;;  %v2243_v12 = vpop.f32.mrb[8].mxu1 }
 0x298   :  { %1165 = vmatprep.mubr.f32.mxu0 %v2977_v0  ;;  %2656 = vmatpush1.bf16.msra.mxu0 %v2655_v19  ;;  %v1254_v14 = vrot.slane %v2243_v12, 1  ;;  %v1238_v15 = vpop.f32.mrb[9].mxu1  ;;  %v2677_v19 = vpack.c.bf16 %v1316_v17, %v1313_v16  ;;  %v1516_v16 = vld [vmem:[#allocation7 + $0x7d8] sm:$0xff] }
 0x299   :  { %2658 = vmatprep.subr.bf16.mxu0 %v2657_v24  ;;  %v1253_v18 = vrot.slane %v1238_v15, 1  ;;  %v1317_v24 = vld [vmem:[#allocation7 + $0x748] sm:$0xff]  ;;  %v1513_v15 = vld [vmem:[#allocation7 + $0x7c0] sm:$0xff] }
 0x29a   :  { %v2709_v30 = vpack.c.bf16 %v1317_v24, %v1314_v22  ;;  %v1514_v22 = vld [vmem:[#allocation7 + $0x7c8] sm:$0xff] }
 0x29b   :  { %1166 = vmatmul.mubr.f32.gmra.mrb[16].mxu0 %v2825_v11  ;;  %v1311_v11 = vld [vmem:[#allocation7 + $0x718] sm:$0xff]  ;;  %v1255_v26 = vsel %vm345_vm0, %v1253_v18, %v1254_v14  ;;  %v1256_v27 = vsel %vm345_vm0, %v1254_v14, %v1253_v18  ;;  %v1515_v14 = vld [vmem:[#allocation7 + $0x7d0] sm:$0xff]  ;;  %v1518_v24 = vld [vmem:[#allocation7 + $0x7e8] sm:$0xff] }
 0x29c   :  { %1388 = vmatprep.mubr.f32.mxu0 %v2977_v0  ;;  %2660 = vmatpush1.bf16.msra.mxu0 %v2659_v31  ;;  %v2705_v13 = vpack.c.bf16 %v1311_v11, %v1308_v7  ;;  %v1319_v31 = vld [vmem:[#allocation7 + $0x758] sm:$0xff]  ;;  %v1257_v63 = vsel %vm3114_vm4, 0.0, %v1255_v26  ;;  %v1258_v1 = vsel %vm3119_vm5, 0.0, %v1256_v27  ;;  %v1505_v7 = vld [vmem:[#allocation7 + $0x780] sm:$0xff]  ;;  %v1519_v27 = vld [vmem:[#allocation7 + $0x7f0] sm:$0xff] }
 0x29d   :  { %2662 = vmatprep.subr.bf16.mxu0 %v2661_v39  ;;  %v2681_v34 = vpack.c.bf16 %v1322_v33, %v1319_v31  ;;  %v2683_v39 = vpack.c.bf16 %v1321_v37, %v1318_v35  ;;  %v1512_v11 = vld [vmem:[#allocation7 + $0x7b8] sm:$0xff]  ;;  %v1521_v26 = vld [vmem:[#allocation7 + $0x800] sm:$0xff]  ;;  %v2723_v31 = vpack.c.bf16 %v1514_v22, %v1511_v21  ;;  %v1550_v21 = vld [vmem:[#allocation7 + $0x8e8] sm:$0xff] }
 0x29e   :  { %2706 = vmatprep.subr.bf16.mxu1 %v2705_v13  ;;  %v2721_v20 = vpack.c.bf16 %v1515_v14, %v1512_v11  ;;  %v2725_v33 = vpack.c.bf16 %v1521_v26, %v1518_v24  ;;  %v1520_v35 = vld [vmem:[#allocation7 + $0x7f8] sm:$0xff]  ;;  %v1541_v11 = vld [vmem:[#allocation7 + $0x8a0] sm:$0xff] }
 0x29f   :  { %2708 = vmatpush3.bf16.msra.mxu1 %v2705_v13  ;;  %v1552_v24 = vld [vmem:[#allocation7 + $0x8f8] sm:$0xff] }
 0x2a0   :  { %2664 = vmatpush1.bf16.msra.mxu0 %v2663_v47  ;;  %2710 = vmatprep.subr.bf16.mxu1 %v2709_v30  ;;  %v2749_v47 = vpack.c.bf16 %v1510_v46, %v1507_v45  ;;  %v1526_v45 = vld [vmem:[#allocation7 + $0x828] sm:$0xff] }
 0x2a1   :  { %2666 = vmatprep.subr.bf16.mxu0 %v2665_v48 }
 0x2a3   :  { %2712 = vmatpush3.bf16.msra.mxu1 %v2709_v30  ;;  %v1522_v30 = vld [vmem:[#allocation7 + $0x808] sm:$0xff] }
 0x2a4   :  { %2668 = vmatpush1.bf16.msra.mxu0 %v2667_v55  ;;  %2714 = vmatprep.subr.bf16.mxu1 %v2713_v44  ;;  %v2757_v37 = vpack.c.bf16 %v1522_v30, %v1519_v27 }
 0x2a5   :  { %2670 = vmatprep.subr.bf16.mxu0 %v2669_v58 }
 0x2a7   :  { %2716 = vmatpush3.bf16.msra.mxu1 %v2713_v44  ;;  %v1528_v44 = vld [vmem:[#allocation7 + $0x838] sm:$0xff] }
 0x2a8   :  { %2672 = vmatpush1.bf16.msra.mxu0 %v2671_v62  ;;  %2750 = vmatprep.subr.bf16.mxu1 %v2749_v47  ;;  %v2761_v46 = vpack.c.bf16 %v1528_v44, %v1525_v43 }
 0x2a9   :  { %2674 = vmatprep.subr.bf16.mxu0 %v2673_v4  ;;  %v1871_v4 = vld [vmem:[#allocation9 + $0x3] ss:$0 sm:$0xff] }
 0x2ac   :  { %2676 = vmatpush1.bf16.msra.mxu0 %v2675_v8  ;;  %v1508_v8 = vld [vmem:[#allocation7 + $0x798] sm:$0xff] }
 0x2ad   :  { %2678 = vmatprep.subr.bf16.mxu0 %v2677_v19  ;;  %v2719_v19 = vpack.c.bf16 %v1508_v8, %v1505_v7  ;;  %v1545_v7 = vld [vmem:[#allocation7 + $0x8c0] sm:$0xff] }
 0x2b0   :  { %2680 = vmatpush1.bf16.msra.mxu0 %v2679_v23  ;;  %v2753_v23 = vpack.c.bf16 %v1516_v16, %v1513_v15  ;;  %v1546_v15 = vld [vmem:[#allocation7 + $0x8c8] sm:$0xff] }
 0x2b1   :  { %2682 = vmatprep.subr.bf16.mxu0 %v2681_v34  ;;  %v1517_v34 = vld [vmem:[#allocation7 + $0x7e0] sm:$0xff] }
 0x2b2   :  { %v2727_v32 = vpack.c.bf16 %v1520_v35, %v1517_v34 }
 0x2b4   :  { %2684 = vmatpush1.bf16.msra.mxu0 %v2683_v39  ;;  %v1524_v39 = vld [vmem:[#allocation7 + $0x818] sm:$0xff] }
 0x2b5   :  { %2718 = vmatprep.subr.bf16.mxu0 %v2717_v29  ;;  %v2729_v49 = vpack.c.bf16 %v1527_v40, %v1524_v39  ;;  %v1523_v29 = vld [vmem:[#allocation7 + $0x810] sm:$0xff] }
 0x34a   :  { %v968_v48 = vpop.f32.mrb[12].mxu0 }
 0x34b   :  { %v3234_v50 = vadd.f32 %v3224_v28, %v968_v48  ;;  %v2173_v51 = vpop.f32.mrb[13].mxu0  ;;  %v1530_v48 = vld [vmem:[#allocation7 + $0x848] sm:$0xff] }
 0x34c   :  { %v1533_v51 = vld [vmem:[#allocation7 + $0x860] sm:$0xff] }
 0x36a   :  { %v1161_v52 = vpop.f32.mrb[14].mxu0 }
 0x36b   :  { %v1163_v55 = vpop.f32.mrb[15].mxu0  ;;  %v1247_v57 = vrot.slane %v1161_v52, 7  ;;  %v2733_v52 = vpack.c.bf16 %v1533_v51, %v1530_v48 }
 0x36e   :  { %v1167_v56 = vpop.f32.mrb[16].mxu0 }
 0x36f   :  { %v1248_v58 = vrot.slane %v1167_v56, 7  ;;  %v1169_v59 = vpop.f32.mrb[17].mxu0  ;;  %v1532_v56 = vld [vmem:[#allocation7 + $0x858] sm:$0xff] }
 0x371   :  { %v1250_v60 = vsel %vm334_vm2, %v1248_v58, %v1247_v57  ;;  %v1249_v61 = vsel %vm334_vm2, %v1247_v57, %v1248_v58  ;;  %v1531_v57 = vld [vmem:[#allocation7 + $0x850] sm:$0xff] }
 0x372   :  { %v1251_v62 = vsel %vm123_vm1, 0.0, %v1250_v60  ;;  %v1252_v28 = vsel %vm124_vm3, 0.0, %v1249_v61  ;;  %v1536_v61 = vld [vmem:[#allocation7 + $0x878] sm:$0xff] }
 0x373   :  { %v1259_v2 = vadd.f32 %v1251_v62, %v1163_v55  ;;  %v1260_v3 = vadd.f32 %v1252_v28, %v1169_v59  ;;  %v1529_v55 = vld [vmem:[#allocation7 + $0x840] sm:$0xff]  ;;  %v1534_v59 = vld [vmem:[#allocation7 + $0x868] sm:$0xff]  ;;  %v1539_v62 = vld [vmem:[#allocation7 + $0x890] sm:$0xff] }
 0x374   :  { %v2735_v58 = vpack.c.bf16 %v1532_v56, %v1529_v55  ;;  %v2765_v60 = vpack.c.bf16 %v1534_v59, %v1531_v57  ;;  %v2737_v28 = vpack.c.bf16 %v1539_v62, %v1536_v61  ;;  %v1872_v55 = vld [vmem:[#allocation9 + $0x4] ss:$0 sm:$0xff]  ;;  %v1750_v62 = vld [vmem:[#allocation10 + $0x100] sm:$0xff] }
 0x375   :  { %v1261_v5 = vadd.f32 %v1259_v2, %v1257_v63  ;;  %v1262_v6 = vadd.f32 %v1260_v3, %v1258_v1  ;;  %v1535_v63 = vld [vmem:[#allocation7 + $0x870] sm:$0xff]  ;;  %v1538_v1 = vld [vmem:[#allocation7 + $0x888] sm:$0xff]  ;;  %v1537_v2 = vld [vmem:[#allocation7 + $0x880] sm:$0xff] }
 0x376   :  { %v2739_v3 = vpack.c.bf16 %v1538_v1, %v1535_v63  ;;  %v1752_v1 = vld [vmem:[#allocation10 + $0x110] sm:$0xff] }
 0x377   :  { %v1271_v12 = vadd.f32 %v1871_v4, %v1261_v5  ;;  %v1272_v13 = vadd.f32 %v1871_v4, %v1262_v6  ;;  %v1540_v4 = vld [vmem:[#allocation7 + $0x898] sm:$0xff]  ;;  %v1542_v6 = vld [vmem:[#allocation7 + $0x8a8] sm:$0xff] }
 0x378   :  { %v2769_v5 = vpack.c.bf16 %v1540_v4, %v1537_v2  ;;  %v2741_v8 = vpack.c.bf16 %v1545_v7, %v1542_v6  ;;  %v1753_v2 = vld [vmem:[#allocation10 + $0x118] sm:$0xff]  ;;  %v1754_v4 = vld [vmem:[#allocation10 + $0x120] sm:$0xff]  ;;  %v1756_v7 = vld [vmem:[#allocation10 + $0x130] sm:$0xff] }
 0x379   :  { %v1273_v17 = vmax.f32 %v1271_v12, 0.0  ;;  %v1274_v18 = vmax.f32 %v1272_v13, 0.0  ;;  %v1544_v12 = vld [vmem:[#allocation7 + $0x8b8] sm:$0xff]  ;;  %v1543_v13 = vld [vmem:[#allocation7 + $0x8b0] sm:$0xff] }
 0x37a   :  { %v2743_v14 = vpack.c.bf16 %v1544_v12, %v1541_v11  ;;  %v2773_v16 = vpack.c.bf16 %v1546_v15, %v1543_v13  ;;  %v1758_v11 = vld [vmem:[#allocation10 + $0x140] sm:$0xff]  ;;  %v1759_v12 = vld [vmem:[#allocation10 + $0x148] sm:$0xff]  ;;  %v1761_v15 = vld [vmem:[#allocation10 + $0x158] sm:$0xff] }
 0x37b   :  { %1389 = vmatmul.mubr.f32.vlgmr.msra.gmra.mrb[18].mxu0 %v1273_v17  ;;  %2276 = vmatprep.mubr.f32.mxu1 %v1273_v17  ;;  %v1548_v17 = vld [vmem:[#allocation7 + $0x8d8] sm:$0xff]  ;;  %v2794_v13 = vpack.c.bf16 %v1759_v12, %v1758_v11 }
 0x37c   :  { %2277 = vmatmul.mubr.f32.vlgmr.msra.gmra.mrb[10].mxu1 %v1274_v18  ;;  %1394 = vmatprep.mubr.f32.mxu0 %v2977_v0 }
 0x37d   :  { %2720 = vmatpush1.bf16.msra.mxu0 %v2719_v19  ;;  %2752 = vmatpush3.bf16.msra.mxu1 %v2749_v47  ;;  %v2731_v47 = vpack.c.bf16 %v1526_v45, %v1523_v29 }
 0x37e   :  { %2722 = vmatprep.subr.bf16.mxu0 %v2721_v20  ;;  %2754 = vmatprep.subr.bf16.mxu1 %v2753_v23  ;;  %v1547_v20 = vld [vmem:[#allocation7 + $0x8d0] sm:$0xff] }
 0x37f   :  { %1395 = vmatmul.mubr.f32.gmra.mrb[20].mxu0 %v1274_v18  ;;  %v1551_v18 = vld [vmem:[#allocation7 + $0x8f0] sm:$0xff]  ;;  %v2747_v22 = vpack.c.bf16 %v1550_v21, %v1547_v20  ;;  %v1765_v21 = vld [vmem:[#allocation10 + $0x178] sm:$0xff] }
 0x380   :  { %1617 = vmatprep.mubr.f32.mxu0 %v2977_v0  ;;  %v2745_v19 = vpack.c.bf16 %v1551_v18, %v1548_v17  ;;  %v1762_v17 = vld [vmem:[#allocation10 + $0x160] sm:$0xff]  ;;  %v1763_v18 = vld [vmem:[#allocation10 + $0x168] sm:$0xff]  ;;  %v1764_v20 = vld [vmem:[#allocation10 + $0x170] sm:$0xff] }
 0x381   :  { %2724 = vmatpush1.bf16.msra.mxu0 %v2723_v31  ;;  %2756 = vmatpush3.bf16.msra.mxu1 %v2753_v23  ;;  %v1549_v23 = vld [vmem:[#allocation7 + $0x8e0] sm:$0xff] }
 0x382   :  { %2726 = vmatprep.subr.bf16.mxu0 %v2725_v33  ;;  %2758 = vmatprep.subr.bf16.mxu1 %v2757_v37  ;;  %v2777_v26 = vpack.c.bf16 %v1552_v24, %v1549_v23 }
 0x385   :  { %2728 = vmatpush1.bf16.msra.mxu0 %v2727_v32  ;;  %2760 = vmatpush3.bf16.msra.mxu1 %v2757_v37 }
 0x386   :  { %2730 = vmatprep.subr.bf16.mxu0 %v2729_v49  ;;  %2762 = vmatprep.subr.bf16.mxu1 %v2761_v46 }
 0x389   :  { %2732 = vmatpush1.bf16.msra.mxu0 %v2731_v47  ;;  %2764 = vmatpush3.bf16.msra.mxu1 %v2761_v46 }
 0x38a   :  { %2734 = vmatprep.subr.bf16.mxu0 %v2733_v52  ;;  %2766 = vmatprep.subr.bf16.mxu1 %v2765_v60 }
 0x38d   :  { %2736 = vmatpush1.bf16.msra.mxu0 %v2735_v58  ;;  %2768 = vmatpush3.bf16.msra.mxu1 %v2765_v60 }
 0x38e   :  { %2738 = vmatprep.subr.bf16.mxu0 %v2737_v28  ;;  %2770 = vmatprep.subr.bf16.mxu1 %v2769_v5  ;;  %v1751_v28 = vld [vmem:[#allocation10 + $0x108] sm:$0xff] }
 0x38f   :  { %v2782_v63 = vpack.c.bf16 %v1751_v28, %v1750_v62 }
 0x391   :  { %2740 = vmatpush1.bf16.msra.mxu0 %v2739_v3  ;;  %2772 = vmatpush3.bf16.msra.mxu1 %v2769_v5  ;;  %v2785_v3 = vpack.c.bf16 %v1753_v2, %v1752_v1  ;;  %v1755_v5 = vld [vmem:[#allocation10 + $0x128] sm:$0xff] }
 0x392   :  { %2742 = vmatprep.subr.bf16.mxu0 %v2741_v8  ;;  %2774 = vmatprep.subr.bf16.mxu1 %v2773_v16  ;;  %v2788_v6 = vpack.c.bf16 %v1755_v5, %v1754_v4  ;;  %v1874_v5 = vld [vmem:[#allocation12] ss:$0 sm:$0xff] }
 0x395   :  { %2744 = vmatpush1.bf16.msra.mxu0 %v2743_v14  ;;  %2776 = vmatpush3.bf16.msra.mxu1 %v2773_v16  ;;  %v1760_v14 = vld [vmem:[#allocation10 + $0x150] sm:$0xff] }
 0x396   :  { %2746 = vmatprep.subr.bf16.mxu0 %v2745_v19  ;;  %2778 = vmatprep.subr.bf16.mxu1 %v2777_v26  ;;  %v2797_v16 = vpack.c.bf16 %v1761_v15, %v1760_v14  ;;  %v2800_v19 = vpack.c.bf16 %v1763_v18, %v1762_v17 }
 0x399   :  { %2748 = vmatpush1.bf16.msra.mxu0 %v2747_v22  ;;  %2780 = vmatpush3.bf16.msra.mxu1 %v2777_v26  ;;  %v2803_v22 = vpack.c.bf16 %v1765_v21, %v1764_v20 }
 0x39a   :  { %2781 = vmatprep.subr.bf16.mxu0 %v2978_v36 }
 0x44e   :  { %v1390_v27 = vpop.f32.mrb[18].mxu0 }
 0x44f   :  { %v1392_v30 = vpop.f32.mrb[19].mxu0  ;;  %v2278_v31 = vpop.f32.mrb[10].mxu1  ;;  %v1476_v39 = vrot.slane %v1390_v27, 7 }
 0x450   :  { %v1483_v33 = vrot.slane %v2278_v31, 1  ;;  %v1467_v34 = vpop.f32.mrb[11].mxu1 }
 0x451   :  { %v1482_v35 = vrot.slane %v1467_v34, 1 }
 0x452   :  { %v1396_v37 = vpop.f32.mrb[20].mxu0 }
 0x453   :  { %v1484_v40 = vsel %vm345_vm0, %v1482_v35, %v1483_v33  ;;  %v1477_v43 = vrot.slane %v1396_v37, 7  ;;  %v1398_v44 = vpop.f32.mrb[21].mxu0  ;;  %v1485_v32 = vsel %vm345_vm0, %v1483_v33, %v1482_v35 }
 0x454   :  { %v1486_v51 = vsel %vm3114_vm4, 0.0, %v1484_v40  ;;  %v1487_v52 = vsel %vm3119_vm5, 0.0, %v1485_v32 }
 0x455   :  { %v1479_v49 = vsel %vm334_vm2, %v1477_v43, %v1476_v39  ;;  %v1478_v29 = vsel %vm334_vm2, %v1476_v39, %v1477_v43 }
 0x456   :  { %v1480_v45 = vsel %vm123_vm1, 0.0, %v1479_v49  ;;  %v1481_v46 = vsel %vm124_vm3, 0.0, %v1478_v29 }
 0x457   :  { %v1488_v47 = vadd.f32 %v1480_v45, %v1392_v30  ;;  %v1489_v48 = vadd.f32 %v1481_v46, %v1398_v44 }
 0x459   :  { %v1490_v56 = vadd.f32 %v1488_v47, %v1486_v51  ;;  %v1491_v57 = vadd.f32 %v1489_v48, %v1487_v52  ;;  %v1873_v47 = vld [vmem:[#allocation9 + $0x5] ss:$0 sm:$0xff] }
 0x45b   :  { %v1500_v58 = vadd.f32 %v1872_v55, %v1490_v56  ;;  %v1501_v59 = vadd.f32 %v1872_v55, %v1491_v57 }
 0x45d   :  { %v1502_v60 = vmax.f32 %v1500_v58, 0.0  ;;  %v1503_v61 = vmax.f32 %v1501_v59, 0.0 }
 0x45f   :  { %1618 = vmatmul.mubr.f32.vlgmr.msra.gmra.mrb[22].mxu0 %v1502_v60  ;;  %2311 = vmatprep.mubr.f32.mxu1 %v1502_v60 }
 0x460   :  { %2312 = vmatmul.mubr.f32.vlgmr.msra.gmra.mrb[12].mxu1 %v1503_v61  ;;  %1623 = vmatprep.mubr.f32.mxu0 %v2977_v0 }
 0x461   :  { %2783 = vmatpush3.bf16.msra.mxu0 %v2782_v63 }
 0x462   :  { %2784 = vmatprep.subr.bf16.mxu0 %v2978_v36 }
 0x463   :  { %1624 = vmatmul.mubr.f32.gmra.mrb[24].mxu0 %v1503_v61 }
 0x464   :  { %2346 = vmatprep.mubr.msk.f32.mxu0 %vm2979_vm9, %v2977_v0  ;;  %v1757_v0 = vld [vmem:[#allocation10 + $0x138] sm:$0xff] }
 0x465   :  { %2786 = vmatpush3.bf16.msra.mxu0 %v2785_v3  ;;  %v2791_v8 = vpack.c.bf16 %v1757_v0, %v1756_v7 }
 0x466   :  { %2787 = vmatprep.subr.bf16.mxu0 %v2978_v36 }
 0x469   :  { %2789 = vmatpush3.bf16.msra.mxu0 %v2788_v6 }
 0x46a   :  { %2790 = vmatprep.subr.bf16.mxu0 %v2978_v36 }
 0x46d   :  { %2792 = vmatpush3.bf16.msra.mxu0 %v2791_v8 }
 0x46e   :  { %2793 = vmatprep.subr.bf16.mxu0 %v2978_v36 }
 0x471   :  { %2795 = vmatpush3.bf16.msra.mxu0 %v2794_v13 }
 0x472   :  { %2796 = vmatprep.subr.bf16.mxu0 %v2978_v36 }
 0x475   :  { %2798 = vmatpush3.bf16.msra.mxu0 %v2797_v16 }
 0x476   :  { %2799 = vmatprep.subr.bf16.mxu0 %v2978_v36 }
 0x479   :  { %2801 = vmatpush3.bf16.msra.mxu0 %v2800_v19 }
 0x47a   :  { %2802 = vmatprep.subr.bf16.mxu0 %v2978_v36 }
 0x47d   :  { %2804 = vmatpush3.bf16.msra.mxu0 %v2803_v22 }
 0x532   :  { %v1619_v23 = vpop.f32.mrb[22].mxu0 }
 0x533   :  { %v1621_v24 = vpop.f32.mrb[23].mxu0  ;;  %v2313_v26 = vpop.f32.mrb[12].mxu1  ;;  %v1705_v34 = vrot.slane %v1619_v23, 7 }
 0x534   :  { %v1712_v27 = vrot.slane %v2313_v26, 1  ;;  %v1696_v30 = vpop.f32.mrb[13].mxu1 }
 0x535   :  { %v1711_v31 = vrot.slane %v1696_v30, 1 }
 0x536   :  { %v1625_v33 = vpop.f32.mrb[24].mxu0 }
 0x537   :  { %v1713_v35 = vsel %vm345_vm0, %v1711_v31, %v1712_v27  ;;  %v1714_v37 = vsel %vm345_vm0, %v1712_v27, %v1711_v31  ;;  %v1706_v39 = vrot.slane %v1625_v33, 7  ;;  %v1627_v36 = vpop.f32.mrb[25].mxu0 }
 0x538   :  { %v1715_v45 = vsel %vm3114_vm4, 0.0, %v1713_v35  ;;  %v1716_v46 = vsel %vm3119_vm5, 0.0, %v1714_v37 }
 0x539   :  { %v1708_v40 = vsel %vm334_vm2, %v1706_v39, %v1705_v34  ;;  %v1707_v43 = vsel %vm334_vm2, %v1705_v34, %v1706_v39 }
 0x53a   :  { %v1709_v44 = vsel %vm123_vm1, 0.0, %v1708_v40  ;;  %v1710_v32 = vsel %vm124_vm3, 0.0, %v1707_v43 }
 0x53b   :  { %v1717_v49 = vadd.f32 %v1709_v44, %v1621_v24  ;;  %v1718_v29 = vadd.f32 %v1710_v32, %v1627_v36 }
 0x53d   :  { %v1719_v48 = vadd.f32 %v1717_v49, %v1715_v45  ;;  %v1720_v51 = vadd.f32 %v1718_v29, %v1716_v46 }
 0x53f   :  { %v1729_v52 = vadd.f32 %v1873_v47, %v1719_v48  ;;  %v1730_v38 = vadd.f32 %v1873_v47, %v1720_v51 }
 0x541   :  { %v1731_v55 = vmax.f32 %v1729_v52, 0.0  ;;  %v1732_v56 = vmax.f32 %v1730_v38, 0.0 }
 0x543   :  { %v1733_v41 = vsel %vm3143_vm6, %v1731_v55, 0.0  ;;  %v1734_v42 = vsel %vm3148_vm7, %v1732_v56, 0.0 }
 0x544   :  { %v1735_v57 = vrot.slane %v1733_v41, 4  ;;  %v1741_v58 = vrot.slane %v1734_v42, 4 }
 0x546   :  { %v1736_v53 = vadd.f32 %v1735_v57, %v1733_v41  ;;  %v1742_v59 = vadd.f32 %v1741_v58, %v1734_v42 }
 0x548   :  { %v1737_v60 = vrot.slane %v1736_v53, 2  ;;  %v1743_v54 = vrot.slane %v1742_v59, 2 }
 0x54a   :  { %v1738_v61 = vadd.f32 %v1737_v60, %v1736_v53  ;;  %v1744_v62 = vadd.f32 %v1743_v54, %v1742_v59 }
 0x54c   :  { %v1739_v28 = vrot.slane %v1738_v61, 1  ;;  %v1745_v63 = vrot.slane %v1744_v62, 1 }
 0x54e   :  { %v1746_v1 = vadd.f32 %v1745_v63, %v1744_v62  ;;  %v1740_v2 = vadd.f32 %v1739_v28, %v1738_v61 }
 0x550   :  { %v1747_v3 = vmul.f32 %v1740_v2, %v3156_v25  ;;  %v1748_v9 = vmul.f32 %v1746_v1, %v3156_v25 }
 0x552   :  { %v1768_v4 = vsel %vm899_vm8, %v1748_v9, %v1747_v3 }
 0x553   :  { %2347 = vmatmul.mubr.f32.vlgmr.msra.gmra.mrb[26].mxu0 %v1768_v4 }
 0x626   :  { %v1836_v10 = vpop.f32.mrb[26].mxu0 }
 0x627   :  { %v1840_v6 = vadd.f32 %v1836_v10, %v3234_v50  ;;  %v2348_v7 = vpop.f32.mrb[27].mxu0 }
 0x629   :  { %v1848_v0 = vadd.f32 %v1874_v5, %v1840_v6 }
 0x62b   :  { %1849 = vst [vmem:[#allocation13] sm:$0x3] %v1848_v0 }
 0x62c   :  { %2947 = shalt.err (!%p2944_p2)
}
 0x62d   :  { %s2948_s14 = scalar_lea.hbm %s3319_s6, 32 }
 0x62e   :  { %p2949_p3 = scmp.ne.s32.totalorder %s3319_s6, %s2948_s14  ;;  %p2952_p4 = scmp.lt.u32.totalorder %s2948_s14, %s3319_s6 }
 0x630   :  { %p2954_p5 = pnand %p2952_p4, %p2949_p3 }
 0x632   :  { %2957 = shalt.err (!%p2954_p5)
}
 0x633   :  { %1859 = dma.vmem_to_hbm [thread:$0]  %s1857_s19, 32, %s3319_s6, [#allocation6]  }
 0x634   :  { %2964 = dma.done.wait [#allocation6], 32  }
 0x635   :  { %2965 = vsyncadd [#allocation6], 4294967264 }
 0x636   :  { %1863 = vsyncpa [#allocation5], 1 }
 0x637   :  { %1864 = vsyncpa [#allocation8], 1 }
 0x638   :  { %1865 = vsyncpa [#allocation11], 1 }
 0x639   :  { %1866 = vsyncpa [#allocation6], 1 }

</bundles_post_ra>
